<compile_context>
chip_gen: v6e
topology: v6e:2x2x1
jax: 0.10.0
libtpu: 0.0.40
codegen_flags: <defaults>
</compile_context>

<pallas_src>
import jax
import jax.numpy as jnp
from jax import lax
from jax.experimental import pallas as pl
from jax.experimental.pallas import tpu as pltpu

_N_SQUARINGS = 10   # effective power-iteration count = 2**10
_EPS = 1e-30


def _sigma_max_sq(f):
    """Top squared singular value of a 2-D matrix, returned as a (1, 1) f32."""
    r, c = f.shape
    # Gram matrix on the smaller side (same nonzero eigenvalues either way).
    if r <= c:
        dims = (((1,), (1,)), ((), ()))   # G = f @ f.T  -> (r, r)
    else:
        dims = (((0,), (0,)), ((), ()))   # G = f.T @ f  -> (c, c)
    G = lax.dot_general(f, f, dims, preferred_element_type=jnp.float32)

    # Repeated squaring with max-abs renormalization. The (arbitrary) scale
    # factors cancel exactly in the final ratio, so only overflow matters.
    H = G / jnp.maximum(jnp.max(jnp.abs(G)), _EPS)
    for _ in range(_N_SQUARINGS):
        H = jnp.dot(H, H, preferred_element_type=jnp.float32)
        H = H / jnp.maximum(jnp.max(jnp.abs(H)), _EPS)

    # H ∝ G^(2^k) ≈ scale * u u^T.  Start-vector-free Rayleigh-type quotient:
    #   sum((G @ H) * H) / sum(H * H) = sum_i lam_i^(2m+1) / sum_i lam_i^(2m)
    GH = jnp.dot(G, H, preferred_element_type=jnp.float32)
    num = jnp.sum(GH * H, keepdims=True)            # (1, 1)
    den = jnp.sum(H * H, keepdims=True) + _EPS      # (1, 1)
    return num / den


def _sd_loss_kernel(f1_ref, f2_ref, f3_ref, out_ref):
    # Three independent eigen-chains, fully unrolled -> interleaved on the MXU.
    total = _sigma_max_sq(f1_ref[...])
    total = total + _sigma_max_sq(f2_ref[...])
    total = total + _sigma_max_sq(f3_ref[...])
    out_ref[...] = total


def sd_loss(f_1, f_2, f_3):
    """Returns sigma_max(f_1)^2 + sigma_max(f_2)^2 + sigma_max(f_3)^2 (scalar f32)."""
    vmem = pl.BlockSpec(memory_space=pltpu.MemorySpace.VMEM)
    out = pl.pallas_call(
        _sd_loss_kernel,
        out_shape=jax.ShapeDtypeStruct((1, 1), jnp.float32),
        in_specs=[vmem, vmem, vmem],
        out_specs=vmem,
        # NOTE: whole matrices + their (small-side) Gram live in VMEM. For very
        # large inputs (v7x: 64 MiB/core) tile the Gram build over the long
        # axis and raise vmem_limit_bytes in pltpu.CompilerParams.
    )(f_1, f_2, f_3)
    return out[0, 0]


if __name__ == "__main__":
    key = jax.random.PRNGKey(0)
    k1, k2, k3 = jax.random.split(key, 3)
    M, N = 16, 32
    f_1 = jax.random.normal(k1, (M, N), jnp.float32)
    f_2 = jax.random.normal(k2, (M, N), jnp.float32)
    f_3 = jax.random.normal(k3, (M, N), jnp.float32)

    loss = jax.block_until_ready(sd_loss(f_1, f_2, f_3))

    # Silent numerical check against a full-SVD reference (plain JAX).
    ref = sum(jnp.linalg.svd(f, compute_uv=False)[0] ** 2
              for f in (f_1, f_2, f_3))
    assert jnp.allclose(loss, ref, rtol=1e-3, atol=1e-3), (loss, ref)

    print("KERNEL_OK")
</pallas_src>

<mosaic_0001>
module attributes {stable_mosaic.version = 11 : i64} {
  func.func @_sd_loss_kernel(%arg0: memref<16x32xf32, #tpu.memory_space<vmem>>, %arg1: memref<16x32xf32, #tpu.memory_space<vmem>>, %arg2: memref<16x32xf32, #tpu.memory_space<vmem>>, %arg3: memref<1x1xf32, #tpu.memory_space<vmem>>) attributes {dimension_semantics = [], scalar_prefetch = 0 : i64, scratch_operands = 0 : i64, tpu.core_type = #tpu.core_type<tc>} {
    %c0 = arith.constant 0 : index
    %c0_0 = arith.constant 0 : index
    %0 = vector.load %arg0[%c0, %c0_0] : memref<16x32xf32, #tpu.memory_space<vmem>>, vector<16x32xf32>
    %cst = arith.constant dense<0.000000e+00> : vector<16x16xf32>
    %1 = tpu.matmul %0, %0, %cst {dimension_numbers = #tpu.dot_dimension_numbers<[1], [1], [0], [0], [0, 0, 1, 0], [], []>} : vector<16x32xf32>, vector<16x32xf32>, vector<16x16xf32> -> vector<16x16xf32>
    %2 = math.absf %1 : vector<16x16xf32>
    %3 = vector.shape_cast %2 : vector<16x16xf32> to vector<1x16x16xf32>
    %cst_1 = arith.constant dense<0xFF800000> : vector<1xf32>
    %4 = vector.multi_reduction <maximumf>, %3, %cst_1 [1, 2] : vector<1x16x16xf32> to vector<1xf32>
    %5 = vector.shape_cast %4 : vector<1xf32> to vector<1x1x1xf32>
    %6 = vector.extract %5[0, 0, 0] : f32 from vector<1x1x1xf32>
    %cst_2 = arith.constant 1.000000e-30 : f32
    %7 = arith.maximumf %6, %cst_2 : f32
    %8 = vector.broadcast %7 : f32 to vector<16x16xf32>
    %9 = arith.divf %1, %8 : vector<16x16xf32>
    %cst_3 = arith.constant dense<0.000000e+00> : vector<16x16xf32>
    %10 = tpu.matmul %9, %9, %cst_3 {dimension_numbers = #tpu.dot_dimension_numbers<[1], [0], [0], [1], [0, 0, 1, 1], [], []>} : vector<16x16xf32>, vector<16x16xf32>, vector<16x16xf32> -> vector<16x16xf32>
    %11 = math.absf %10 : vector<16x16xf32>
    %12 = vector.shape_cast %11 : vector<16x16xf32> to vector<1x16x16xf32>
    %cst_4 = arith.constant dense<0xFF800000> : vector<1xf32>
    %13 = vector.multi_reduction <maximumf>, %12, %cst_4 [1, 2] : vector<1x16x16xf32> to vector<1xf32>
    %14 = vector.shape_cast %13 : vector<1xf32> to vector<1x1x1xf32>
    %15 = vector.extract %14[0, 0, 0] : f32 from vector<1x1x1xf32>
    %cst_5 = arith.constant 1.000000e-30 : f32
    %16 = arith.maximumf %15, %cst_5 : f32
    %17 = vector.broadcast %16 : f32 to vector<16x16xf32>
    %18 = arith.divf %10, %17 : vector<16x16xf32>
    %cst_6 = arith.constant dense<0.000000e+00> : vector<16x16xf32>
    %19 = tpu.matmul %18, %18, %cst_6 {dimension_numbers = #tpu.dot_dimension_numbers<[1], [0], [0], [1], [0, 0, 1, 1], [], []>} : vector<16x16xf32>, vector<16x16xf32>, vector<16x16xf32> -> vector<16x16xf32>
    %20 = math.absf %19 : vector<16x16xf32>
    %21 = vector.shape_cast %20 : vector<16x16xf32> to vector<1x16x16xf32>
    %cst_7 = arith.constant dense<0xFF800000> : vector<1xf32>
    %22 = vector.multi_reduction <maximumf>, %21, %cst_7 [1, 2] : vector<1x16x16xf32> to vector<1xf32>
    %23 = vector.shape_cast %22 : vector<1xf32> to vector<1x1x1xf32>
    %24 = vector.extract %23[0, 0, 0] : f32 from vector<1x1x1xf32>
    %cst_8 = arith.constant 1.000000e-30 : f32
    %25 = arith.maximumf %24, %cst_8 : f32
    %26 = vector.broadcast %25 : f32 to vector<16x16xf32>
    %27 = arith.divf %19, %26 : vector<16x16xf32>
    %cst_9 = arith.constant dense<0.000000e+00> : vector<16x16xf32>
    %28 = tpu.matmul %27, %27, %cst_9 {dimension_numbers = #tpu.dot_dimension_numbers<[1], [0], [0], [1], [0, 0, 1, 1], [], []>} : vector<16x16xf32>, vector<16x16xf32>, vector<16x16xf32> -> vector<16x16xf32>
    %29 = math.absf %28 : vector<16x16xf32>
    %30 = vector.shape_cast %29 : vector<16x16xf32> to vector<1x16x16xf32>
    %cst_10 = arith.constant dense<0xFF800000> : vector<1xf32>
    %31 = vector.multi_reduction <maximumf>, %30, %cst_10 [1, 2] : vector<1x16x16xf32> to vector<1xf32>
    %32 = vector.shape_cast %31 : vector<1xf32> to vector<1x1x1xf32>
    %33 = vector.extract %32[0, 0, 0] : f32 from vector<1x1x1xf32>
    %cst_11 = arith.constant 1.000000e-30 : f32
    %34 = arith.maximumf %33, %cst_11 : f32
    %35 = vector.broadcast %34 : f32 to vector<16x16xf32>
    %36 = arith.divf %28, %35 : vector<16x16xf32>
    %cst_12 = arith.constant dense<0.000000e+00> : vector<16x16xf32>
    %37 = tpu.matmul %36, %36, %cst_12 {dimension_numbers = #tpu.dot_dimension_numbers<[1], [0], [0], [1], [0, 0, 1, 1], [], []>} : vector<16x16xf32>, vector<16x16xf32>, vector<16x16xf32> -> vector<16x16xf32>
    %38 = math.absf %37 : vector<16x16xf32>
    %39 = vector.shape_cast %38 : vector<16x16xf32> to vector<1x16x16xf32>
    %cst_13 = arith.constant dense<0xFF800000> : vector<1xf32>
    %40 = vector.multi_reduction <maximumf>, %39, %cst_13 [1, 2] : vector<1x16x16xf32> to vector<1xf32>
    %41 = vector.shape_cast %40 : vector<1xf32> to vector<1x1x1xf32>
    %42 = vector.extract %41[0, 0, 0] : f32 from vector<1x1x1xf32>
    %cst_14 = arith.constant 1.000000e-30 : f32
    %43 = arith.maximumf %42, %cst_14 : f32
    %44 = vector.broadcast %43 : f32 to vector<16x16xf32>
    %45 = arith.divf %37, %44 : vector<16x16xf32>
    %cst_15 = arith.constant dense<0.000000e+00> : vector<16x16xf32>
    %46 = tpu.matmul %45, %45, %cst_15 {dimension_numbers = #tpu.dot_dimension_numbers<[1], [0], [0], [1], [0, 0, 1, 1], [], []>} : vector<16x16xf32>, vector<16x16xf32>, vector<16x16xf32> -> vector<16x16xf32>
    %47 = math.absf %46 : vector<16x16xf32>
    %48 = vector.shape_cast %47 : vector<16x16xf32> to vector<1x16x16xf32>
    %cst_16 = arith.constant dense<0xFF800000> : vector<1xf32>
    %49 = vector.multi_reduction <maximumf>, %48, %cst_16 [1, 2] : vector<1x16x16xf32> to vector<1xf32>
    %50 = vector.shape_cast %49 : vector<1xf32> to vector<1x1x1xf32>
    %51 = vector.extract %50[0, 0, 0] : f32 from vector<1x1x1xf32>
    %cst_17 = arith.constant 1.000000e-30 : f32
    %52 = arith.maximumf %51, %cst_17 : f32
    %53 = vector.broadcast %52 : f32 to vector<16x16xf32>
    %54 = arith.divf %46, %53 : vector<16x16xf32>
    %cst_18 = arith.constant dense<0.000000e+00> : vector<16x16xf32>
    %55 = tpu.matmul %54, %54, %cst_18 {dimension_numbers = #tpu.dot_dimension_numbers<[1], [0], [0], [1], [0, 0, 1, 1], [], []>} : vector<16x16xf32>, vector<16x16xf32>, vector<16x16xf32> -> vector<16x16xf32>
    %56 = math.absf %55 : vector<16x16xf32>
    %57 = vector.shape_cast %56 : vector<16x16xf32> to vector<1x16x16xf32>
    %cst_19 = arith.constant dense<0xFF800000> : vector<1xf32>
    %58 = vector.multi_reduction <maximumf>, %57, %cst_19 [1, 2] : vector<1x16x16xf32> to vector<1xf32>
    %59 = vector.shape_cast %58 : vector<1xf32> to vector<1x1x1xf32>
    %60 = vector.extract %59[0, 0, 0] : f32 from vector<1x1x1xf32>
    %cst_20 = arith.constant 1.000000e-30 : f32
    %61 = arith.maximumf %60, %cst_20 : f32
    %62 = vector.broadcast %61 : f32 to vector<16x16xf32>
    %63 = arith.divf %55, %62 : vector<16x16xf32>
    %cst_21 = arith.constant dense<0.000000e+00> : vector<16x16xf32>
    %64 = tpu.matmul %63, %63, %cst_21 {dimension_numbers = #tpu.dot_dimension_numbers<[1], [0], [0], [1], [0, 0, 1, 1], [], []>} : vector<16x16xf32>, vector<16x16xf32>, vector<16x16xf32> -> vector<16x16xf32>
    %65 = math.absf %64 : vector<16x16xf32>
    %66 = vector.shape_cast %65 : vector<16x16xf32> to vector<1x16x16xf32>
    %cst_22 = arith.constant dense<0xFF800000> : vector<1xf32>
    %67 = vector.multi_reduction <maximumf>, %66, %cst_22 [1, 2] : vector<1x16x16xf32> to vector<1xf32>
    %68 = vector.shape_cast %67 : vector<1xf32> to vector<1x1x1xf32>
    %69 = vector.extract %68[0, 0, 0] : f32 from vector<1x1x1xf32>
    %cst_23 = arith.constant 1.000000e-30 : f32
    %70 = arith.maximumf %69, %cst_23 : f32
    %71 = vector.broadcast %70 : f32 to vector<16x16xf32>
    %72 = arith.divf %64, %71 : vector<16x16xf32>
    %cst_24 = arith.constant dense<0.000000e+00> : vector<16x16xf32>
    %73 = tpu.matmul %72, %72, %cst_24 {dimension_numbers = #tpu.dot_dimension_numbers<[1], [0], [0], [1], [0, 0, 1, 1], [], []>} : vector<16x16xf32>, vector<16x16xf32>, vector<16x16xf32> -> vector<16x16xf32>
    %74 = math.absf %73 : vector<16x16xf32>
    %75 = vector.shape_cast %74 : vector<16x16xf32> to vector<1x16x16xf32>
    %cst_25 = arith.constant dense<0xFF800000> : vector<1xf32>
    %76 = vector.multi_reduction <maximumf>, %75, %cst_25 [1, 2] : vector<1x16x16xf32> to vector<1xf32>
    %77 = vector.shape_cast %76 : vector<1xf32> to vector<1x1x1xf32>
    %78 = vector.extract %77[0, 0, 0] : f32 from vector<1x1x1xf32>
    %cst_26 = arith.constant 1.000000e-30 : f32
    %79 = arith.maximumf %78, %cst_26 : f32
    %80 = vector.broadcast %79 : f32 to vector<16x16xf32>
    %81 = arith.divf %73, %80 : vector<16x16xf32>
    %cst_27 = arith.constant dense<0.000000e+00> : vector<16x16xf32>
    %82 = tpu.matmul %81, %81, %cst_27 {dimension_numbers = #tpu.dot_dimension_numbers<[1], [0], [0], [1], [0, 0, 1, 1], [], []>} : vector<16x16xf32>, vector<16x16xf32>, vector<16x16xf32> -> vector<16x16xf32>
    %83 = math.absf %82 : vector<16x16xf32>
    %84 = vector.shape_cast %83 : vector<16x16xf32> to vector<1x16x16xf32>
    %cst_28 = arith.constant dense<0xFF800000> : vector<1xf32>
    %85 = vector.multi_reduction <maximumf>, %84, %cst_28 [1, 2] : vector<1x16x16xf32> to vector<1xf32>
    %86 = vector.shape_cast %85 : vector<1xf32> to vector<1x1x1xf32>
    %87 = vector.extract %86[0, 0, 0] : f32 from vector<1x1x1xf32>
    %cst_29 = arith.constant 1.000000e-30 : f32
    %88 = arith.maximumf %87, %cst_29 : f32
    %89 = vector.broadcast %88 : f32 to vector<16x16xf32>
    %90 = arith.divf %82, %89 : vector<16x16xf32>
    %cst_30 = arith.constant dense<0.000000e+00> : vector<16x16xf32>
    %91 = tpu.matmul %90, %90, %cst_30 {dimension_numbers = #tpu.dot_dimension_numbers<[1], [0], [0], [1], [0, 0, 1, 1], [], []>} : vector<16x16xf32>, vector<16x16xf32>, vector<16x16xf32> -> vector<16x16xf32>
    %92 = math.absf %91 : vector<16x16xf32>
    %93 = vector.shape_cast %92 : vector<16x16xf32> to vector<1x16x16xf32>
    %cst_31 = arith.constant dense<0xFF800000> : vector<1xf32>
    %94 = vector.multi_reduction <maximumf>, %93, %cst_31 [1, 2] : vector<1x16x16xf32> to vector<1xf32>
    %95 = vector.shape_cast %94 : vector<1xf32> to vector<1x1x1xf32>
    %96 = vector.extract %95[0, 0, 0] : f32 from vector<1x1x1xf32>
    %cst_32 = arith.constant 1.000000e-30 : f32
    %97 = arith.maximumf %96, %cst_32 : f32
    %98 = vector.broadcast %97 : f32 to vector<16x16xf32>
    %99 = arith.divf %91, %98 : vector<16x16xf32>
    %cst_33 = arith.constant dense<0.000000e+00> : vector<16x16xf32>
    %100 = tpu.matmul %1, %99, %cst_33 {dimension_numbers = #tpu.dot_dimension_numbers<[1], [0], [0], [1], [0, 0, 1, 1], [], []>} : vector<16x16xf32>, vector<16x16xf32>, vector<16x16xf32> -> vector<16x16xf32>
    %101 = arith.mulf %100, %99 : vector<16x16xf32>
    %102 = vector.shape_cast %101 : vector<16x16xf32> to vector<1x16x16xf32>
    %cst_34 = arith.constant dense<0.000000e+00> : vector<1xf32>
    %103 = vector.multi_reduction <add>, %102, %cst_34 [1, 2] : vector<1x16x16xf32> to vector<1xf32>
    %104 = vector.shape_cast %103 : vector<1xf32> to vector<1x1x1xf32>
    %105 = vector.extract %104[0, 0, 0] : f32 from vector<1x1x1xf32>
    %106 = vector.broadcast %105 : f32 to vector<1x1xf32>
    %107 = arith.mulf %99, %99 : vector<16x16xf32>
    %108 = vector.shape_cast %107 : vector<16x16xf32> to vector<1x16x16xf32>
    %cst_35 = arith.constant dense<0.000000e+00> : vector<1xf32>
    %109 = vector.multi_reduction <add>, %108, %cst_35 [1, 2] : vector<1x16x16xf32> to vector<1xf32>
    %110 = vector.shape_cast %109 : vector<1xf32> to vector<1x1x1xf32>
    %111 = vector.extract %110[0, 0, 0] : f32 from vector<1x1x1xf32>
    %112 = vector.broadcast %111 : f32 to vector<1x1xf32>
    %cst_36 = arith.constant 1.000000e-30 : f32
    %113 = vector.broadcast %cst_36 : f32 to vector<1x1xf32>
    %114 = arith.addf %112, %113 : vector<1x1xf32>
    %115 = arith.divf %106, %114 : vector<1x1xf32>
    %c0_37 = arith.constant 0 : index
    %c0_38 = arith.constant 0 : index
    %116 = vector.load %arg1[%c0_37, %c0_38] : memref<16x32xf32, #tpu.memory_space<vmem>>, vector<16x32xf32>
    %cst_39 = arith.constant dense<0.000000e+00> : vector<16x16xf32>
    %117 = tpu.matmul %116, %116, %cst_39 {dimension_numbers = #tpu.dot_dimension_numbers<[1], [1], [0], [0], [0, 0, 1, 0], [], []>} : vector<16x32xf32>, vector<16x32xf32>, vector<16x16xf32> -> vector<16x16xf32>
    %118 = math.absf %117 : vector<16x16xf32>
    %119 = vector.shape_cast %118 : vector<16x16xf32> to vector<1x16x16xf32>
    %cst_40 = arith.constant dense<0xFF800000> : vector<1xf32>
    %120 = vector.multi_reduction <maximumf>, %119, %cst_40 [1, 2] : vector<1x16x16xf32> to vector<1xf32>
    %121 = vector.shape_cast %120 : vector<1xf32> to vector<1x1x1xf32>
    %122 = vector.extract %121[0, 0, 0] : f32 from vector<1x1x1xf32>
    %cst_41 = arith.constant 1.000000e-30 : f32
    %123 = arith.maximumf %122, %cst_41 : f32
    %124 = vector.broadcast %123 : f32 to vector<16x16xf32>
    %125 = arith.divf %117, %124 : vector<16x16xf32>
    %cst_42 = arith.constant dense<0.000000e+00> : vector<16x16xf32>
    %126 = tpu.matmul %125, %125, %cst_42 {dimension_numbers = #tpu.dot_dimension_numbers<[1], [0], [0], [1], [0, 0, 1, 1], [], []>} : vector<16x16xf32>, vector<16x16xf32>, vector<16x16xf32> -> vector<16x16xf32>
    %127 = math.absf %126 : vector<16x16xf32>
    %128 = vector.shape_cast %127 : vector<16x16xf32> to vector<1x16x16xf32>
    %cst_43 = arith.constant dense<0xFF800000> : vector<1xf32>
    %129 = vector.multi_reduction <maximumf>, %128, %cst_43 [1, 2] : vector<1x16x16xf32> to vector<1xf32>
    %130 = vector.shape_cast %129 : vector<1xf32> to vector<1x1x1xf32>
    %131 = vector.extract %130[0, 0, 0] : f32 from vector<1x1x1xf32>
    %cst_44 = arith.constant 1.000000e-30 : f32
    %132 = arith.maximumf %131, %cst_44 : f32
    %133 = vector.broadcast %132 : f32 to vector<16x16xf32>
    %134 = arith.divf %126, %133 : vector<16x16xf32>
    %cst_45 = arith.constant dense<0.000000e+00> : vector<16x16xf32>
    %135 = tpu.matmul %134, %134, %cst_45 {dimension_numbers = #tpu.dot_dimension_numbers<[1], [0], [0], [1], [0, 0, 1, 1], [], []>} : vector<16x16xf32>, vector<16x16xf32>, vector<16x16xf32> -> vector<16x16xf32>
    %136 = math.absf %135 : vector<16x16xf32>
    %137 = vector.shape_cast %136 : vector<16x16xf32> to vector<1x16x16xf32>
    %cst_46 = arith.constant dense<0xFF800000> : vector<1xf32>
    %138 = vector.multi_reduction <maximumf>, %137, %cst_46 [1, 2] : vector<1x16x16xf32> to vector<1xf32>
    %139 = vector.shape_cast %138 : vector<1xf32> to vector<1x1x1xf32>
    %140 = vector.extract %139[0, 0, 0] : f32 from vector<1x1x1xf32>
    %cst_47 = arith.constant 1.000000e-30 : f32
    %141 = arith.maximumf %140, %cst_47 : f32
    %142 = vector.broadcast %141 : f32 to vector<16x16xf32>
    %143 = arith.divf %135, %142 : vector<16x16xf32>
    %cst_48 = arith.constant dense<0.000000e+00> : vector<16x16xf32>
    %144 = tpu.matmul %143, %143, %cst_48 {dimension_numbers = #tpu.dot_dimension_numbers<[1], [0], [0], [1], [0, 0, 1, 1], [], []>} : vector<16x16xf32>, vector<16x16xf32>, vector<16x16xf32> -> vector<16x16xf32>
    %145 = math.absf %144 : vector<16x16xf32>
    %146 = vector.shape_cast %145 : vector<16x16xf32> to vector<1x16x16xf32>
    %cst_49 = arith.constant dense<0xFF800000> : vector<1xf32>
    %147 = vector.multi_reduction <maximumf>, %146, %cst_49 [1, 2] : vector<1x16x16xf32> to vector<1xf32>
    %148 = vector.shape_cast %147 : vector<1xf32> to vector<1x1x1xf32>
    %149 = vector.extract %148[0, 0, 0] : f32 from vector<1x1x1xf32>
    %cst_50 = arith.constant 1.000000e-30 : f32
    %150 = arith.maximumf %149, %cst_50 : f32
    %151 = vector.broadcast %150 : f32 to vector<16x16xf32>
    %152 = arith.divf %144, %151 : vector<16x16xf32>
    %cst_51 = arith.constant dense<0.000000e+00> : vector<16x16xf32>
    %153 = tpu.matmul %152, %152, %cst_51 {dimension_numbers = #tpu.dot_dimension_numbers<[1], [0], [0], [1], [0, 0, 1, 1], [], []>} : vector<16x16xf32>, vector<16x16xf32>, vector<16x16xf32> -> vector<16x16xf32>
    %154 = math.absf %153 : vector<16x16xf32>
    %155 = vector.shape_cast %154 : vector<16x16xf32> to vector<1x16x16xf32>
    %cst_52 = arith.constant dense<0xFF800000> : vector<1xf32>
    %156 = vector.multi_reduction <maximumf>, %155, %cst_52 [1, 2] : vector<1x16x16xf32> to vector<1xf32>
    %157 = vector.shape_cast %156 : vector<1xf32> to vector<1x1x1xf32>
    %158 = vector.extract %157[0, 0, 0] : f32 from vector<1x1x1xf32>
    %cst_53 = arith.constant 1.000000e-30 : f32
    %159 = arith.maximumf %158, %cst_53 : f32
    %160 = vector.broadcast %159 : f32 to vector<16x16xf32>
    %161 = arith.divf %153, %160 : vector<16x16xf32>
    %cst_54 = arith.constant dense<0.000000e+00> : vector<16x16xf32>
    %162 = tpu.matmul %161, %161, %cst_54 {dimension_numbers = #tpu.dot_dimension_numbers<[1], [0], [0], [1], [0, 0, 1, 1], [], []>} : vector<16x16xf32>, vector<16x16xf32>, vector<16x16xf32> -> vector<16x16xf32>
    %163 = math.absf %162 : vector<16x16xf32>
    %164 = vector.shape_cast %163 : vector<16x16xf32> to vector<1x16x16xf32>
    %cst_55 = arith.constant dense<0xFF800000> : vector<1xf32>
    %165 = vector.multi_reduction <maximumf>, %164, %cst_55 [1, 2] : vector<1x16x16xf32> to vector<1xf32>
    %166 = vector.shape_cast %165 : vector<1xf32> to vector<1x1x1xf32>
    %167 = vector.extract %166[0, 0, 0] : f32 from vector<1x1x1xf32>
    %cst_56 = arith.constant 1.000000e-30 : f32
    %168 = arith.maximumf %167, %cst_56 : f32
    %169 = vector.broadcast %168 : f32 to vector<16x16xf32>
    %170 = arith.divf %162, %169 : vector<16x16xf32>
    %cst_57 = arith.constant dense<0.000000e+00> : vector<16x16xf32>
    %171 = tpu.matmul %170, %170, %cst_57 {dimension_numbers = #tpu.dot_dimension_numbers<[1], [0], [0], [1], [0, 0, 1, 1], [], []>} : vector<16x16xf32>, vector<16x16xf32>, vector<16x16xf32> -> vector<16x16xf32>
    %172 = math.absf %171 : vector<16x16xf32>
    %173 = vector.shape_cast %172 : vector<16x16xf32> to vector<1x16x16xf32>
    %cst_58 = arith.constant dense<0xFF800000> : vector<1xf32>
    %174 = vector.multi_reduction <maximumf>, %173, %cst_58 [1, 2] : vector<1x16x16xf32> to vector<1xf32>
    %175 = vector.shape_cast %174 : vector<1xf32> to vector<1x1x1xf32>
    %176 = vector.extract %175[0, 0, 0] : f32 from vector<1x1x1xf32>
    %cst_59 = arith.constant 1.000000e-30 : f32
    %177 = arith.maximumf %176, %cst_59 : f32
    %178 = vector.broadcast %177 : f32 to vector<16x16xf32>
    %179 = arith.divf %171, %178 : vector<16x16xf32>
    %cst_60 = arith.constant dense<0.000000e+00> : vector<16x16xf32>
    %180 = tpu.matmul %179, %179, %cst_60 {dimension_numbers = #tpu.dot_dimension_numbers<[1], [0], [0], [1], [0, 0, 1, 1], [], []>} : vector<16x16xf32>, vector<16x16xf32>, vector<16x16xf32> -> vector<16x16xf32>
    %181 = math.absf %180 : vector<16x16xf32>
    %182 = vector.shape_cast %181 : vector<16x16xf32> to vector<1x16x16xf32>
    %cst_61 = arith.constant dense<0xFF800000> : vector<1xf32>
    %183 = vector.multi_reduction <maximumf>, %182, %cst_61 [1, 2] : vector<1x16x16xf32> to vector<1xf32>
    %184 = vector.shape_cast %183 : vector<1xf32> to vector<1x1x1xf32>
    %185 = vector.extract %184[0, 0, 0] : f32 from vector<1x1x1xf32>
    %cst_62 = arith.constant 1.000000e-30 : f32
    %186 = arith.maximumf %185, %cst_62 : f32
    %187 = vector.broadcast %186 : f32 to vector<16x16xf32>
    %188 = arith.divf %180, %187 : vector<16x16xf32>
    %cst_63 = arith.constant dense<0.000000e+00> : vector<16x16xf32>
    %189 = tpu.matmul %188, %188, %cst_63 {dimension_numbers = #tpu.dot_dimension_numbers<[1], [0], [0], [1], [0, 0, 1, 1], [], []>} : vector<16x16xf32>, vector<16x16xf32>, vector<16x16xf32> -> vector<16x16xf32>
    %190 = math.absf %189 : vector<16x16xf32>
    %191 = vector.shape_cast %190 : vector<16x16xf32> to vector<1x16x16xf32>
    %cst_64 = arith.constant dense<0xFF800000> : vector<1xf32>
    %192 = vector.multi_reduction <maximumf>, %191, %cst_64 [1, 2] : vector<1x16x16xf32> to vector<1xf32>
    %193 = vector.shape_cast %192 : vector<1xf32> to vector<1x1x1xf32>
    %194 = vector.extract %193[0, 0, 0] : f32 from vector<1x1x1xf32>
    %cst_65 = arith.constant 1.000000e-30 : f32
    %195 = arith.maximumf %194, %cst_65 : f32
    %196 = vector.broadcast %195 : f32 to vector<16x16xf32>
    %197 = arith.divf %189, %196 : vector<16x16xf32>
    %cst_66 = arith.constant dense<0.000000e+00> : vector<16x16xf32>
    %198 = tpu.matmul %197, %197, %cst_66 {dimension_numbers = #tpu.dot_dimension_numbers<[1], [0], [0], [1], [0, 0, 1, 1], [], []>} : vector<16x16xf32>, vector<16x16xf32>, vector<16x16xf32> -> vector<16x16xf32>
    %199 = math.absf %198 : vector<16x16xf32>
    %200 = vector.shape_cast %199 : vector<16x16xf32> to vector<1x16x16xf32>
    %cst_67 = arith.constant dense<0xFF800000> : vector<1xf32>
    %201 = vector.multi_reduction <maximumf>, %200, %cst_67 [1, 2] : vector<1x16x16xf32> to vector<1xf32>
    %202 = vector.shape_cast %201 : vector<1xf32> to vector<1x1x1xf32>
    %203 = vector.extract %202[0, 0, 0] : f32 from vector<1x1x1xf32>
    %cst_68 = arith.constant 1.000000e-30 : f32
    %204 = arith.maximumf %203, %cst_68 : f32
    %205 = vector.broadcast %204 : f32 to vector<16x16xf32>
    %206 = arith.divf %198, %205 : vector<16x16xf32>
    %cst_69 = arith.constant dense<0.000000e+00> : vector<16x16xf32>
    %207 = tpu.matmul %206, %206, %cst_69 {dimension_numbers = #tpu.dot_dimension_numbers<[1], [0], [0], [1], [0, 0, 1, 1], [], []>} : vector<16x16xf32>, vector<16x16xf32>, vector<16x16xf32> -> vector<16x16xf32>
    %208 = math.absf %207 : vector<16x16xf32>
    %209 = vector.shape_cast %208 : vector<16x16xf32> to vector<1x16x16xf32>
    %cst_70 = arith.constant dense<0xFF800000> : vector<1xf32>
    %210 = vector.multi_reduction <maximumf>, %209, %cst_70 [1, 2] : vector<1x16x16xf32> to vector<1xf32>
    %211 = vector.shape_cast %210 : vector<1xf32> to vector<1x1x1xf32>
    %212 = vector.extract %211[0, 0, 0] : f32 from vector<1x1x1xf32>
    %cst_71 = arith.constant 1.000000e-30 : f32
    %213 = arith.maximumf %212, %cst_71 : f32
    %214 = vector.broadcast %213 : f32 to vector<16x16xf32>
    %215 = arith.divf %207, %214 : vector<16x16xf32>
    %cst_72 = arith.constant dense<0.000000e+00> : vector<16x16xf32>
    %216 = tpu.matmul %117, %215, %cst_72 {dimension_numbers = #tpu.dot_dimension_numbers<[1], [0], [0], [1], [0, 0, 1, 1], [], []>} : vector<16x16xf32>, vector<16x16xf32>, vector<16x16xf32> -> vector<16x16xf32>
    %217 = arith.mulf %216, %215 : vector<16x16xf32>
    %218 = vector.shape_cast %217 : vector<16x16xf32> to vector<1x16x16xf32>
    %cst_73 = arith.constant dense<0.000000e+00> : vector<1xf32>
    %219 = vector.multi_reduction <add>, %218, %cst_73 [1, 2] : vector<1x16x16xf32> to vector<1xf32>
    %220 = vector.shape_cast %219 : vector<1xf32> to vector<1x1x1xf32>
    %221 = vector.extract %220[0, 0, 0] : f32 from vector<1x1x1xf32>
    %222 = vector.broadcast %221 : f32 to vector<1x1xf32>
    %223 = arith.mulf %215, %215 : vector<16x16xf32>
    %224 = vector.shape_cast %223 : vector<16x16xf32> to vector<1x16x16xf32>
    %cst_74 = arith.constant dense<0.000000e+00> : vector<1xf32>
    %225 = vector.multi_reduction <add>, %224, %cst_74 [1, 2] : vector<1x16x16xf32> to vector<1xf32>
    %226 = vector.shape_cast %225 : vector<1xf32> to vector<1x1x1xf32>
    %227 = vector.extract %226[0, 0, 0] : f32 from vector<1x1x1xf32>
    %228 = vector.broadcast %227 : f32 to vector<1x1xf32>
    %cst_75 = arith.constant 1.000000e-30 : f32
    %229 = vector.broadcast %cst_75 : f32 to vector<1x1xf32>
    %230 = arith.addf %228, %229 : vector<1x1xf32>
    %231 = arith.divf %222, %230 : vector<1x1xf32>
    %232 = arith.addf %115, %231 : vector<1x1xf32>
    %c0_76 = arith.constant 0 : index
    %c0_77 = arith.constant 0 : index
    %233 = vector.load %arg2[%c0_76, %c0_77] : memref<16x32xf32, #tpu.memory_space<vmem>>, vector<16x32xf32>
    %cst_78 = arith.constant dense<0.000000e+00> : vector<16x16xf32>
    %234 = tpu.matmul %233, %233, %cst_78 {dimension_numbers = #tpu.dot_dimension_numbers<[1], [1], [0], [0], [0, 0, 1, 0], [], []>} : vector<16x32xf32>, vector<16x32xf32>, vector<16x16xf32> -> vector<16x16xf32>
    %235 = math.absf %234 : vector<16x16xf32>
    %236 = vector.shape_cast %235 : vector<16x16xf32> to vector<1x16x16xf32>
    %cst_79 = arith.constant dense<0xFF800000> : vector<1xf32>
    %237 = vector.multi_reduction <maximumf>, %236, %cst_79 [1, 2] : vector<1x16x16xf32> to vector<1xf32>
    %238 = vector.shape_cast %237 : vector<1xf32> to vector<1x1x1xf32>
    %239 = vector.extract %238[0, 0, 0] : f32 from vector<1x1x1xf32>
    %cst_80 = arith.constant 1.000000e-30 : f32
    %240 = arith.maximumf %239, %cst_80 : f32
    %241 = vector.broadcast %240 : f32 to vector<16x16xf32>
    %242 = arith.divf %234, %241 : vector<16x16xf32>
    %cst_81 = arith.constant dense<0.000000e+00> : vector<16x16xf32>
    %243 = tpu.matmul %242, %242, %cst_81 {dimension_numbers = #tpu.dot_dimension_numbers<[1], [0], [0], [1], [0, 0, 1, 1], [], []>} : vector<16x16xf32>, vector<16x16xf32>, vector<16x16xf32> -> vector<16x16xf32>
    %244 = math.absf %243 : vector<16x16xf32>
    %245 = vector.shape_cast %244 : vector<16x16xf32> to vector<1x16x16xf32>
    %cst_82 = arith.constant dense<0xFF800000> : vector<1xf32>
    %246 = vector.multi_reduction <maximumf>, %245, %cst_82 [1, 2] : vector<1x16x16xf32> to vector<1xf32>
    %247 = vector.shape_cast %246 : vector<1xf32> to vector<1x1x1xf32>
    %248 = vector.extract %247[0, 0, 0] : f32 from vector<1x1x1xf32>
    %cst_83 = arith.constant 1.000000e-30 : f32
    %249 = arith.maximumf %248, %cst_83 : f32
    %250 = vector.broadcast %249 : f32 to vector<16x16xf32>
    %251 = arith.divf %243, %250 : vector<16x16xf32>
    %cst_84 = arith.constant dense<0.000000e+00> : vector<16x16xf32>
    %252 = tpu.matmul %251, %251, %cst_84 {dimension_numbers = #tpu.dot_dimension_numbers<[1], [0], [0], [1], [0, 0, 1, 1], [], []>} : vector<16x16xf32>, vector<16x16xf32>, vector<16x16xf32> -> vector<16x16xf32>
    %253 = math.absf %252 : vector<16x16xf32>
    %254 = vector.shape_cast %253 : vector<16x16xf32> to vector<1x16x16xf32>
    %cst_85 = arith.constant dense<0xFF800000> : vector<1xf32>
    %255 = vector.multi_reduction <maximumf>, %254, %cst_85 [1, 2] : vector<1x16x16xf32> to vector<1xf32>
    %256 = vector.shape_cast %255 : vector<1xf32> to vector<1x1x1xf32>
    %257 = vector.extract %256[0, 0, 0] : f32 from vector<1x1x1xf32>
    %cst_86 = arith.constant 1.000000e-30 : f32
    %258 = arith.maximumf %257, %cst_86 : f32
    %259 = vector.broadcast %258 : f32 to vector<16x16xf32>
    %260 = arith.divf %252, %259 : vector<16x16xf32>
    %cst_87 = arith.constant dense<0.000000e+00> : vector<16x16xf32>
    %261 = tpu.matmul %260, %260, %cst_87 {dimension_numbers = #tpu.dot_dimension_numbers<[1], [0], [0], [1], [0, 0, 1, 1], [], []>} : vector<16x16xf32>, vector<16x16xf32>, vector<16x16xf32> -> vector<16x16xf32>
    %262 = math.absf %261 : vector<16x16xf32>
    %263 = vector.shape_cast %262 : vector<16x16xf32> to vector<1x16x16xf32>
    %cst_88 = arith.constant dense<0xFF800000> : vector<1xf32>
    %264 = vector.multi_reduction <maximumf>, %263, %cst_88 [1, 2] : vector<1x16x16xf32> to vector<1xf32>
    %265 = vector.shape_cast %264 : vector<1xf32> to vector<1x1x1xf32>
    %266 = vector.extract %265[0, 0, 0] : f32 from vector<1x1x1xf32>
    %cst_89 = arith.constant 1.000000e-30 : f32
    %267 = arith.maximumf %266, %cst_89 : f32
    %268 = vector.broadcast %267 : f32 to vector<16x16xf32>
    %269 = arith.divf %261, %268 : vector<16x16xf32>
    %cst_90 = arith.constant dense<0.000000e+00> : vector<16x16xf32>
    %270 = tpu.matmul %269, %269, %cst_90 {dimension_numbers = #tpu.dot_dimension_numbers<[1], [0], [0], [1], [0, 0, 1, 1], [], []>} : vector<16x16xf32>, vector<16x16xf32>, vector<16x16xf32> -> vector<16x16xf32>
    %271 = math.absf %270 : vector<16x16xf32>
    %272 = vector.shape_cast %271 : vector<16x16xf32> to vector<1x16x16xf32>
    %cst_91 = arith.constant dense<0xFF800000> : vector<1xf32>
    %273 = vector.multi_reduction <maximumf>, %272, %cst_91 [1, 2] : vector<1x16x16xf32> to vector<1xf32>
    %274 = vector.shape_cast %273 : vector<1xf32> to vector<1x1x1xf32>
    %275 = vector.extract %274[0, 0, 0] : f32 from vector<1x1x1xf32>
    %cst_92 = arith.constant 1.000000e-30 : f32
    %276 = arith.maximumf %275, %cst_92 : f32
    %277 = vector.broadcast %276 : f32 to vector<16x16xf32>
    %278 = arith.divf %270, %277 : vector<16x16xf32>
    %cst_93 = arith.constant dense<0.000000e+00> : vector<16x16xf32>
    %279 = tpu.matmul %278, %278, %cst_93 {dimension_numbers = #tpu.dot_dimension_numbers<[1], [0], [0], [1], [0, 0, 1, 1], [], []>} : vector<16x16xf32>, vector<16x16xf32>, vector<16x16xf32> -> vector<16x16xf32>
    %280 = math.absf %279 : vector<16x16xf32>
    %281 = vector.shape_cast %280 : vector<16x16xf32> to vector<1x16x16xf32>
    %cst_94 = arith.constant dense<0xFF800000> : vector<1xf32>
    %282 = vector.multi_reduction <maximumf>, %281, %cst_94 [1, 2] : vector<1x16x16xf32> to vector<1xf32>
    %283 = vector.shape_cast %282 : vector<1xf32> to vector<1x1x1xf32>
    %284 = vector.extract %283[0, 0, 0] : f32 from vector<1x1x1xf32>
    %cst_95 = arith.constant 1.000000e-30 : f32
    %285 = arith.maximumf %284, %cst_95 : f32
    %286 = vector.broadcast %285 : f32 to vector<16x16xf32>
    %287 = arith.divf %279, %286 : vector<16x16xf32>
    %cst_96 = arith.constant dense<0.000000e+00> : vector<16x16xf32>
    %288 = tpu.matmul %287, %287, %cst_96 {dimension_numbers = #tpu.dot_dimension_numbers<[1], [0], [0], [1], [0, 0, 1, 1], [], []>} : vector<16x16xf32>, vector<16x16xf32>, vector<16x16xf32> -> vector<16x16xf32>
    %289 = math.absf %288 : vector<16x16xf32>
    %290 = vector.shape_cast %289 : vector<16x16xf32> to vector<1x16x16xf32>
    %cst_97 = arith.constant dense<0xFF800000> : vector<1xf32>
    %291 = vector.multi_reduction <maximumf>, %290, %cst_97 [1, 2] : vector<1x16x16xf32> to vector<1xf32>
    %292 = vector.shape_cast %291 : vector<1xf32> to vector<1x1x1xf32>
    %293 = vector.extract %292[0, 0, 0] : f32 from vector<1x1x1xf32>
    %cst_98 = arith.constant 1.000000e-30 : f32
    %294 = arith.maximumf %293, %cst_98 : f32
    %295 = vector.broadcast %294 : f32 to vector<16x16xf32>
    %296 = arith.divf %288, %295 : vector<16x16xf32>
    %cst_99 = arith.constant dense<0.000000e+00> : vector<16x16xf32>
    %297 = tpu.matmul %296, %296, %cst_99 {dimension_numbers = #tpu.dot_dimension_numbers<[1], [0], [0], [1], [0, 0, 1, 1], [], []>} : vector<16x16xf32>, vector<16x16xf32>, vector<16x16xf32> -> vector<16x16xf32>
    %298 = math.absf %297 : vector<16x16xf32>
    %299 = vector.shape_cast %298 : vector<16x16xf32> to vector<1x16x16xf32>
    %cst_100 = arith.constant dense<0xFF800000> : vector<1xf32>
    %300 = vector.multi_reduction <maximumf>, %299, %cst_100 [1, 2] : vector<1x16x16xf32> to vector<1xf32>
    %301 = vector.shape_cast %300 : vector<1xf32> to vector<1x1x1xf32>
    %302 = vector.extract %301[0, 0, 0] : f32 from vector<1x1x1xf32>
    %cst_101 = arith.constant 1.000000e-30 : f32
    %303 = arith.maximumf %302, %cst_101 : f32
    %304 = vector.broadcast %303 : f32 to vector<16x16xf32>
    %305 = arith.divf %297, %304 : vector<16x16xf32>
    %cst_102 = arith.constant dense<0.000000e+00> : vector<16x16xf32>
    %306 = tpu.matmul %305, %305, %cst_102 {dimension_numbers = #tpu.dot_dimension_numbers<[1], [0], [0], [1], [0, 0, 1, 1], [], []>} : vector<16x16xf32>, vector<16x16xf32>, vector<16x16xf32> -> vector<16x16xf32>
    %307 = math.absf %306 : vector<16x16xf32>
    %308 = vector.shape_cast %307 : vector<16x16xf32> to vector<1x16x16xf32>
    %cst_103 = arith.constant dense<0xFF800000> : vector<1xf32>
    %309 = vector.multi_reduction <maximumf>, %308, %cst_103 [1, 2] : vector<1x16x16xf32> to vector<1xf32>
    %310 = vector.shape_cast %309 : vector<1xf32> to vector<1x1x1xf32>
    %311 = vector.extract %310[0, 0, 0] : f32 from vector<1x1x1xf32>
    %cst_104 = arith.constant 1.000000e-30 : f32
    %312 = arith.maximumf %311, %cst_104 : f32
    %313 = vector.broadcast %312 : f32 to vector<16x16xf32>
    %314 = arith.divf %306, %313 : vector<16x16xf32>
    %cst_105 = arith.constant dense<0.000000e+00> : vector<16x16xf32>
    %315 = tpu.matmul %314, %314, %cst_105 {dimension_numbers = #tpu.dot_dimension_numbers<[1], [0], [0], [1], [0, 0, 1, 1], [], []>} : vector<16x16xf32>, vector<16x16xf32>, vector<16x16xf32> -> vector<16x16xf32>
    %316 = math.absf %315 : vector<16x16xf32>
    %317 = vector.shape_cast %316 : vector<16x16xf32> to vector<1x16x16xf32>
    %cst_106 = arith.constant dense<0xFF800000> : vector<1xf32>
    %318 = vector.multi_reduction <maximumf>, %317, %cst_106 [1, 2] : vector<1x16x16xf32> to vector<1xf32>
    %319 = vector.shape_cast %318 : vector<1xf32> to vector<1x1x1xf32>
    %320 = vector.extract %319[0, 0, 0] : f32 from vector<1x1x1xf32>
    %cst_107 = arith.constant 1.000000e-30 : f32
    %321 = arith.maximumf %320, %cst_107 : f32
    %322 = vector.broadcast %321 : f32 to vector<16x16xf32>
    %323 = arith.divf %315, %322 : vector<16x16xf32>
    %cst_108 = arith.constant dense<0.000000e+00> : vector<16x16xf32>
    %324 = tpu.matmul %323, %323, %cst_108 {dimension_numbers = #tpu.dot_dimension_numbers<[1], [0], [0], [1], [0, 0, 1, 1], [], []>} : vector<16x16xf32>, vector<16x16xf32>, vector<16x16xf32> -> vector<16x16xf32>
    %325 = math.absf %324 : vector<16x16xf32>
    %326 = vector.shape_cast %325 : vector<16x16xf32> to vector<1x16x16xf32>
    %cst_109 = arith.constant dense<0xFF800000> : vector<1xf32>
    %327 = vector.multi_reduction <maximumf>, %326, %cst_109 [1, 2] : vector<1x16x16xf32> to vector<1xf32>
    %328 = vector.shape_cast %327 : vector<1xf32> to vector<1x1x1xf32>
    %329 = vector.extract %328[0, 0, 0] : f32 from vector<1x1x1xf32>
    %cst_110 = arith.constant 1.000000e-30 : f32
    %330 = arith.maximumf %329, %cst_110 : f32
    %331 = vector.broadcast %330 : f32 to vector<16x16xf32>
    %332 = arith.divf %324, %331 : vector<16x16xf32>
    %cst_111 = arith.constant dense<0.000000e+00> : vector<16x16xf32>
    %333 = tpu.matmul %234, %332, %cst_111 {dimension_numbers = #tpu.dot_dimension_numbers<[1], [0], [0], [1], [0, 0, 1, 1], [], []>} : vector<16x16xf32>, vector<16x16xf32>, vector<16x16xf32> -> vector<16x16xf32>
    %334 = arith.mulf %333, %332 : vector<16x16xf32>
    %335 = vector.shape_cast %334 : vector<16x16xf32> to vector<1x16x16xf32>
    %cst_112 = arith.constant dense<0.000000e+00> : vector<1xf32>
    %336 = vector.multi_reduction <add>, %335, %cst_112 [1, 2] : vector<1x16x16xf32> to vector<1xf32>
    %337 = vector.shape_cast %336 : vector<1xf32> to vector<1x1x1xf32>
    %338 = vector.extract %337[0, 0, 0] : f32 from vector<1x1x1xf32>
    %339 = vector.broadcast %338 : f32 to vector<1x1xf32>
    %340 = arith.mulf %332, %332 : vector<16x16xf32>
    %341 = vector.shape_cast %340 : vector<16x16xf32> to vector<1x16x16xf32>
    %cst_113 = arith.constant dense<0.000000e+00> : vector<1xf32>
    %342 = vector.multi_reduction <add>, %341, %cst_113 [1, 2] : vector<1x16x16xf32> to vector<1xf32>
    %343 = vector.shape_cast %342 : vector<1xf32> to vector<1x1x1xf32>
    %344 = vector.extract %343[0, 0, 0] : f32 from vector<1x1x1xf32>
    %345 = vector.broadcast %344 : f32 to vector<1x1xf32>
    %cst_114 = arith.constant 1.000000e-30 : f32
    %346 = vector.broadcast %cst_114 : f32 to vector<1x1xf32>
    %347 = arith.addf %345, %346 : vector<1x1xf32>
    %348 = arith.divf %339, %347 : vector<1x1xf32>
    %349 = arith.addf %232, %348 : vector<1x1xf32>
    %c0_115 = arith.constant 0 : index
    %c0_116 = arith.constant 0 : index
    %350 = vector.load %arg3[%c0_115, %c0_116] : memref<1x1xf32, #tpu.memory_space<vmem>>, vector<1x1xf32>
    tpu.vector_store %arg3[%c0_115, %c0_116], %349 {strides = array<i32>} : memref<1x1xf32, #tpu.memory_space<vmem>>, vector<1x1xf32>,
    return
  }
}

</mosaic_0001>

<bundles_post_ra>
// kernel: tpu_custom_call.1
= control target key start
LH: loop header
LB: loop body
LE: loop exit
PB: predicated region body
PF: predicated region fallthrough
CT: control target
= control target key end

     0   :  { %8 = vsyncpa [#allocation3], 0  ;;  %s4713_s0 = inlined_call_operand.hbm [shape: f32[16,32], index: 0, kind: input, shape index: {}]   ;;  %s4714_s1 = inlined_call_operand.hbm [shape: f32[16,32], index: 1, kind: input, shape index: {}]   ;;  %s4715_s2 = inlined_call_operand.hbm [shape: f32[16,32], index: 2, kind: input, shape index: {}]   ;;  %s4716_s3 = inlined_call_operand.hbm [shape: f32[1,1], index: 3, kind: output, shape index: {}]  }
   0x1   :  { %9 = vsyncpa [#allocation6], 0 }
   0x2   :  { %10 = vsyncpa [#allocation4], 0  ;;  %s4443_s12 = smov [#allocation5]   ;;  %s4444_s14 = smov [#allocation2]  }
   0x3   :  { %s28_s13 = sshll.u32 %s4443_s12, 4  ;;  %s16_s15 = sshll.u32 %s4444_s14, 4  ;;  %s29_s13 = int_to_ptr.vmem [resolvable:$true] %s28_s13  ;;  %s17_s15 = int_to_ptr.vmem [resolvable:$true] %s16_s15 }
   0x4   :  { %s4365_s16 = scalar_lea.vmem %s29_s13, 256  ;;  %p4370_p1 = scmp.lt.s32.totalorder %s29_s13, %s29_s13 }
   0x5   :  { %p4366_p0 = scmp.ne.s32.totalorder %s29_s13, %s4365_s16  ;;  %p4371_p2 = scmp.lt.s32.totalorder %s4365_s16, %s4365_s16 }
   0x7   :  { %p4372_p3 = por %p4371_p2, %p4370_p1 }
   0x9   :  { %p4373_p4 = pnand %p4372_p3, %p4366_p0 }
   0xb   :  { %4376 = shalt.err (!%p4373_p4)
}
   0xc   :  { %s4445_s17 = smov 128   ;;  %s4446_s18 = smov 8  }
   0xd   :  { %34 = dma.hbm_to_vmem [thread:$0]  %s4714_s1, 256, %s29_s13, [#allocation6], %s4445_s17, %s4445_s17, %s4446_s18  }
   0xe   :  { %s4385_s21 = scalar_lea.vmem %s17_s15, 256  ;;  %p4390_p6 = scmp.lt.s32.totalorder %s17_s15, %s17_s15 }
   0xf   :  { %p4386_p5 = scmp.ne.s32.totalorder %s17_s15, %s4385_s21  ;;  %p4391_p7 = scmp.lt.s32.totalorder %s4385_s21, %s4385_s21 }
  0x11   :  { %p4392_p8 = por %p4391_p7, %p4390_p6 }
  0x13   :  { %p4393_p9 = pnand %p4392_p8, %p4386_p5 }
  0x15   :  { %4396 = shalt.err (!%p4393_p9)
}
  0x16   :  { %22 = dma.hbm_to_vmem [thread:$0]  %s4713_s0, 256, %s17_s15, [#allocation3], %s4445_s17, %s4445_s17, %s4446_s18  }
  0x17   :  { %s4447_s24 = smov [#allocation7]  }
  0x18   :  { %s40_s25 = sshll.u32 %s4447_s24, 4  ;;  %s41_s25 = int_to_ptr.vmem [resolvable:$true] %s40_s25 }
  0x19   :  { %s4405_s26 = scalar_lea.vmem %s41_s25, 256  ;;  %p4410_p11 = scmp.lt.s32.totalorder %s41_s25, %s41_s25 }
  0x1a   :  { %p4406_p10 = scmp.ne.s32.totalorder %s41_s25, %s4405_s26  ;;  %p4411_p12 = scmp.lt.s32.totalorder %s4405_s26, %s4405_s26 }
  0x1c   :  { %p4412_p13 = por %p4411_p12, %p4410_p11 }
  0x1e   :  { %p4413_p0 = pnand %p4412_p13, %p4406_p10 }
  0x20   :  { %4416 = shalt.err (!%p4413_p0)
}
  0x21   :  { %46 = dma.hbm_to_vmem [thread:$0]  %s4715_s2, 256, %s41_s25, [#allocation6], %s4445_s17, %s4445_s17, %s4446_s18  }
  0x22   :  { %4437 = dma.done.wait [#allocation3], 256  }
  0x23   :  { %4438 = vsyncadd [#allocation3], 4294967040 }
  0x24   :  { %4439 = dma.done.wait [#allocation6], 512  }
  0x25   :  { %4440 = vsyncadd [#allocation6], 4294966784  ;;  %vm58_vm0 = vcmask 261120   ;;  %v57_v0 = vld [vmem:[#allocation2 + $0x8] sm:$0xff]  ;;  %v56_v1 = vld [vmem:[#allocation2] sm:$0xff]  ;;  %vm142_vm1 = vcmask 130048  }
  0x26   :  { %3948 = vmatprep.subr.msk.mxu0 %vm58_vm0, %v57_v0  ;;  %3952 = vmatprep.mubr.msk.f32.mxu0 %vm58_vm0, %v56_v1  ;;  %s4448_s2 = smov 1e-30   ;;  %vm3708_vm2 = vcmask 0  }
  0x27   :  { %3949 = vmatpush3.xpose.msk.msra.mxu0 %vm58_vm0, %v57_v0 }
  0x28   :  { %3950 = vmatprep.subr.msk.mxu0 %vm58_vm0, %v56_v1 }
  0x2b   :  { %3951 = vmatpush3.xpose.msk.msra.mxu0 %vm58_vm0, %v56_v1 }
  0x2e   :  { %3953 = vmatmul.mubr.msk.f32.vlgmr.msra.gmra.mxu0 %vm58_vm0, %v57_v0 }
  0xee   :  { %v4485_v2 = vpop.f32.mrf.mxu0 }
  0xef   :  { %v141_v3 = vand.u32 2147483647, %v4485_v2 }
  0xf0   :  { %v4488_v4 = vpop.f32.mrf.mxu0 }
  0xf1   :  { %v140_v5 = vand.u32 2147483647, %v4488_v4  ;;  %v144_v7 = vsel %vm142_vm1, %v141_v3, -inf }
  0xf3   :  { %v143_v6 = vsel %vm142_vm1, %v140_v5, -inf }
  0xf4   :  { %v145_v8 = vmax.f32 %v143_v6, %v144_v7 }
  0xf6   :  { %146 = vmax.xlane.f32.xlu0 %v145_v8 }
 0x17f   :  { %v147_v9 = vpop.xlane.xlu0 %146 }
 0x180   :  { %v148_v10 = vrot.slane %v147_v9, 4 }
 0x182   :  { %v149_v11 = vmax.f32 %v147_v9, %v148_v10 }
 0x184   :  { %v150_v12 = vrot.slane %v149_v11, 2 }
 0x186   :  { %v151_v13 = vmax.f32 %v149_v11, %v150_v12 }
 0x188   :  { %v152_v14 = vrot.slane %v151_v13, 1 }
 0x18a   :  { %v153_v15 = vmax.f32 %v151_v13, %v152_v14 }
 0x18c   :  { %4200 = vpush %v153_v15 }
 0x1bd   :  { %s4201_s0 = spop %4200 }
 0x1be   :  { %s155_s28 = smax.f32 %s4448_s2, %s4201_s0 }
 0x1bf   :  { %v156_v16 = vstv %s155_s28 }
 0x1c0   :  { %4285 = vrcp.f32 %v156_v16 }
 0x1cd   :  { %v4286_v17 = vpop.eup %4285 }
 0x1ce   :  { %v159_v18 = vmul.f32 %v4286_v17, %v4485_v2  ;;  %v158_v19 = vmul.f32 %v4286_v17, %v4488_v4 }
 0x1d0   :  { %3955 = vmatprep.subr.mxu1 %v159_v18  ;;  %3959 = vmatprep.mubr.msk.f32.mxu1 %vm142_vm1, %v158_v19 }
 0x1d1   :  { %3956 = vmatpush3.msra.mxu1 %v159_v18 }
 0x1d2   :  { %3957 = vmatprep.subr.mxu1 %v158_v19 }
 0x1d3   :  { %3958 = vmatpush3.msra.mxu1 %v158_v19 }
 0x1d4   :  { %3960 = vmatmul.mubr.msk.f32.vlgmr.msra.gmra.mxu1 %vm142_vm1, %v159_v18 }
 0x294   :  { %v3961_v20 = vpop.f32.mrf.mxu1 }
 0x295   :  { %v242_v21 = vand.u32 2147483647, %v3961_v20 }
 0x296   :  { %v232_v22 = vpop.f32.mrf.mxu1 }
 0x297   :  { %v241_v23 = vand.u32 2147483647, %v232_v22  ;;  %v244_v25 = vsel %vm142_vm1, %v242_v21, -inf }
 0x299   :  { %v243_v24 = vsel %vm142_vm1, %v241_v23, -inf }
 0x29a   :  { %v245_v26 = vmax.f32 %v243_v24, %v244_v25 }
 0x29c   :  { %246 = vmax.xlane.f32.xlu0 %v245_v26 }
 0x325   :  { %v247_v27 = vpop.xlane.xlu0 %246 }
 0x326   :  { %v248_v28 = vrot.slane %v247_v27, 4 }
 0x328   :  { %v249_v29 = vmax.f32 %v247_v27, %v248_v28 }
 0x32a   :  { %v250_v30 = vrot.slane %v249_v29, 2 }
 0x32c   :  { %v251_v31 = vmax.f32 %v249_v29, %v250_v30 }
 0x32e   :  { %v252_v32 = vrot.slane %v251_v31, 1 }
 0x330   :  { %v253_v33 = vmax.f32 %v251_v31, %v252_v32 }
 0x332   :  { %4202 = vpush %v253_v33 }
 0x363   :  { %s4203_s29 = spop %4202 }
 0x364   :  { %s255_s30 = smax.f32 %s4448_s2, %s4203_s29 }
 0x365   :  { %v256_v34 = vstv %s255_s30 }
 0x366   :  { %4287 = vrcp.f32 %v256_v34 }
 0x373   :  { %v4288_v35 = vpop.eup %4287 }
 0x374   :  { %v259_v36 = vmul.f32 %v4288_v35, %v3961_v20  ;;  %v258_v37 = vmul.f32 %v4288_v35, %v232_v22 }
 0x376   :  { %3962 = vmatprep.subr.mxu1 %v259_v36  ;;  %3966 = vmatprep.mubr.msk.f32.mxu1 %vm142_vm1, %v258_v37 }
 0x377   :  { %3963 = vmatpush3.msra.mxu1 %v259_v36 }
 0x378   :  { %3964 = vmatprep.subr.mxu1 %v258_v37 }
 0x379   :  { %3965 = vmatpush3.msra.mxu1 %v258_v37 }
 0x37a   :  { %3967 = vmatmul.mubr.msk.f32.vlgmr.msra.gmra.mxu1 %vm142_vm1, %v259_v36 }
 0x43a   :  { %v3968_v38 = vpop.f32.mrf.mxu1 }
 0x43b   :  { %v342_v39 = vand.u32 2147483647, %v3968_v38 }
 0x43c   :  { %v332_v40 = vpop.f32.mrf.mxu1 }
 0x43d   :  { %v341_v41 = vand.u32 2147483647, %v332_v40  ;;  %v344_v43 = vsel %vm142_vm1, %v342_v39, -inf }
 0x43f   :  { %v343_v42 = vsel %vm142_vm1, %v341_v41, -inf }
 0x440   :  { %v345_v44 = vmax.f32 %v343_v42, %v344_v43 }
 0x442   :  { %346 = vmax.xlane.f32.xlu1 %v345_v44 }
 0x4cb   :  { %v347_v45 = vpop.xlane.xlu1 %346 }
 0x4cc   :  { %v348_v46 = vrot.slane %v347_v45, 4 }
 0x4ce   :  { %v349_v47 = vmax.f32 %v347_v45, %v348_v46 }
 0x4d0   :  { %v350_v48 = vrot.slane %v349_v47, 2 }
 0x4d2   :  { %v351_v49 = vmax.f32 %v349_v47, %v350_v48 }
 0x4d4   :  { %v352_v50 = vrot.slane %v351_v49, 1 }
 0x4d6   :  { %v353_v51 = vmax.f32 %v351_v49, %v352_v50 }
 0x4d8   :  { %4204 = vpush %v353_v51 }
 0x509   :  { %s4205_s4 = spop %4204 }
 0x50a   :  { %s355_s5 = smax.f32 %s4448_s2, %s4205_s4 }
 0x50b   :  { %v356_v52 = vstv %s355_s5 }
 0x50c   :  { %4289 = vrcp.f32 %v356_v52 }
 0x519   :  { %v4290_v53 = vpop.eup %4289 }
 0x51a   :  { %v359_v54 = vmul.f32 %v4290_v53, %v3968_v38  ;;  %v358_v55 = vmul.f32 %v4290_v53, %v332_v40 }
 0x51c   :  { %3969 = vmatprep.subr.mxu0 %v359_v54  ;;  %3973 = vmatprep.mubr.msk.f32.mxu0 %vm142_vm1, %v358_v55 }
 0x51d   :  { %3970 = vmatpush3.msra.mxu0 %v359_v54 }
 0x51e   :  { %3971 = vmatprep.subr.mxu0 %v358_v55 }
 0x51f   :  { %3972 = vmatpush3.msra.mxu0 %v358_v55 }
 0x520   :  { %3974 = vmatmul.mubr.msk.f32.vlgmr.msra.gmra.mxu0 %vm142_vm1, %v359_v54 }
 0x5e0   :  { %v3975_v56 = vpop.f32.mrf.mxu0 }
 0x5e1   :  { %v442_v57 = vand.u32 2147483647, %v3975_v56 }
 0x5e2   :  { %v432_v58 = vpop.f32.mrf.mxu0 }
 0x5e3   :  { %v441_v59 = vand.u32 2147483647, %v432_v58  ;;  %v444_v61 = vsel %vm142_vm1, %v442_v57, -inf }
 0x5e5   :  { %v443_v60 = vsel %vm142_vm1, %v441_v59, -inf }
 0x5e6   :  { %v445_v62 = vmax.f32 %v443_v60, %v444_v61 }
 0x5e8   :  { %446 = vmax.xlane.f32.xlu1 %v445_v62 }
 0x671   :  { %v447_v63 = vpop.xlane.xlu1 %446 }
 0x672   :  { %v448_v0 = vrot.slane %v447_v63, 4 }
 0x674   :  { %v449_v1 = vmax.f32 %v447_v63, %v448_v0 }
 0x676   :  { %v450_v3 = vrot.slane %v449_v1, 2 }
 0x678   :  { %v451_v5 = vmax.f32 %v449_v1, %v450_v3 }
 0x67a   :  { %v452_v6 = vrot.slane %v451_v5, 1 }
 0x67c   :  { %v453_v7 = vmax.f32 %v451_v5, %v452_v6 }
 0x67e   :  { %4206 = vpush %v453_v7 }
 0x6af   :  { %s4207_s6 = spop %4206 }
 0x6b0   :  { %s455_s7 = smax.f32 %s4448_s2, %s4207_s6 }
 0x6b1   :  { %v456_v8 = vstv %s455_s7 }
 0x6b2   :  { %4291 = vrcp.f32 %v456_v8 }
 0x6bf   :  { %v4292_v9 = vpop.eup %4291 }
 0x6c0   :  { %v459_v10 = vmul.f32 %v4292_v9, %v3975_v56  ;;  %v458_v11 = vmul.f32 %v4292_v9, %v432_v58 }
 0x6c2   :  { %3976 = vmatprep.subr.mxu1 %v459_v10  ;;  %3980 = vmatprep.mubr.msk.f32.mxu1 %vm142_vm1, %v458_v11 }
 0x6c3   :  { %3977 = vmatpush3.msra.mxu1 %v459_v10 }
 0x6c4   :  { %3978 = vmatprep.subr.mxu1 %v458_v11 }
 0x6c5   :  { %3979 = vmatpush3.msra.mxu1 %v458_v11 }
 0x6c6   :  { %3981 = vmatmul.mubr.msk.f32.vlgmr.msra.gmra.mxu1 %vm142_vm1, %v459_v10 }
 0x786   :  { %v3982_v12 = vpop.f32.mrf.mxu1 }
 0x787   :  { %v542_v13 = vand.u32 2147483647, %v3982_v12 }
 0x788   :  { %v532_v14 = vpop.f32.mrf.mxu1 }
 0x789   :  { %v541_v15 = vand.u32 2147483647, %v532_v14  ;;  %v544_v17 = vsel %vm142_vm1, %v542_v13, -inf }
 0x78b   :  { %v543_v16 = vsel %vm142_vm1, %v541_v15, -inf }
 0x78c   :  { %v545_v18 = vmax.f32 %v543_v16, %v544_v17 }
 0x78e   :  { %546 = vmax.xlane.f32.xlu0 %v545_v18 }
 0x817   :  { %v547_v19 = vpop.xlane.xlu0 %546 }
 0x818   :  { %v548_v20 = vrot.slane %v547_v19, 4 }
 0x81a   :  { %v549_v21 = vmax.f32 %v547_v19, %v548_v20 }
 0x81c   :  { %v550_v22 = vrot.slane %v549_v21, 2 }
 0x81e   :  { %v551_v23 = vmax.f32 %v549_v21, %v550_v22 }
 0x820   :  { %v552_v24 = vrot.slane %v551_v23, 1 }
 0x822   :  { %v553_v25 = vmax.f32 %v551_v23, %v552_v24 }
 0x824   :  { %4208 = vpush %v553_v25 }
 0x855   :  { %s4209_s8 = spop %4208 }
 0x856   :  { %s555_s9 = smax.f32 %s4448_s2, %s4209_s8 }
 0x857   :  { %v556_v26 = vstv %s555_s9 }
 0x858   :  { %4293 = vrcp.f32 %v556_v26 }
 0x865   :  { %v4294_v27 = vpop.eup %4293 }
 0x866   :  { %v559_v28 = vmul.f32 %v4294_v27, %v3982_v12  ;;  %v558_v29 = vmul.f32 %v4294_v27, %v532_v14 }
 0x868   :  { %3983 = vmatprep.subr.mxu0 %v559_v28  ;;  %3987 = vmatprep.mubr.msk.f32.mxu0 %vm142_vm1, %v558_v29 }
 0x869   :  { %3984 = vmatpush3.msra.mxu0 %v559_v28 }
 0x86a   :  { %3985 = vmatprep.subr.mxu0 %v558_v29 }
 0x86b   :  { %3986 = vmatpush3.msra.mxu0 %v558_v29 }
 0x86c   :  { %3988 = vmatmul.mubr.msk.f32.vlgmr.msra.gmra.mxu0 %vm142_vm1, %v559_v28 }
 0x92c   :  { %v3989_v30 = vpop.f32.mrf.mxu0 }
 0x92d   :  { %v642_v31 = vand.u32 2147483647, %v3989_v30 }
 0x92e   :  { %v632_v32 = vpop.f32.mrf.mxu0 }
 0x92f   :  { %v641_v33 = vand.u32 2147483647, %v632_v32  ;;  %v644_v35 = vsel %vm142_vm1, %v642_v31, -inf }
 0x931   :  { %v643_v34 = vsel %vm142_vm1, %v641_v33, -inf }
 0x932   :  { %v645_v36 = vmax.f32 %v643_v34, %v644_v35 }
 0x934   :  { %646 = vmax.xlane.f32.xlu1 %v645_v36 }
 0x9bd   :  { %v647_v37 = vpop.xlane.xlu1 %646 }
 0x9be   :  { %v648_v38 = vrot.slane %v647_v37, 4 }
 0x9c0   :  { %v649_v39 = vmax.f32 %v647_v37, %v648_v38 }
 0x9c2   :  { %v650_v40 = vrot.slane %v649_v39, 2 }
 0x9c4   :  { %v651_v41 = vmax.f32 %v649_v39, %v650_v40 }
 0x9c6   :  { %v652_v42 = vrot.slane %v651_v41, 1 }
 0x9c8   :  { %v653_v43 = vmax.f32 %v651_v41, %v652_v42 }
 0x9ca   :  { %4210 = vpush %v653_v43 }
 0x9fb   :  { %s4211_s10 = spop %4210 }
 0x9fc   :  { %s655_s11 = smax.f32 %s4448_s2, %s4211_s10 }
 0x9fd   :  { %v656_v44 = vstv %s655_s11 }
 0x9fe   :  { %4295 = vrcp.f32 %v656_v44 }
 0xa0b   :  { %v4296_v45 = vpop.eup %4295 }
 0xa0c   :  { %v659_v46 = vmul.f32 %v4296_v45, %v3989_v30  ;;  %v658_v47 = vmul.f32 %v4296_v45, %v632_v32 }
 0xa0e   :  { %3990 = vmatprep.subr.mxu1 %v659_v46  ;;  %3994 = vmatprep.mubr.msk.f32.mxu1 %vm142_vm1, %v658_v47 }
 0xa0f   :  { %3991 = vmatpush3.msra.mxu1 %v659_v46 }
 0xa10   :  { %3992 = vmatprep.subr.mxu1 %v658_v47 }
 0xa11   :  { %3993 = vmatpush3.msra.mxu1 %v658_v47 }
 0xa12   :  { %3995 = vmatmul.mubr.msk.f32.vlgmr.msra.gmra.mxu1 %vm142_vm1, %v659_v46 }
 0xad2   :  { %v3996_v48 = vpop.f32.mrf.mxu1 }
 0xad3   :  { %v742_v49 = vand.u32 2147483647, %v3996_v48 }
 0xad4   :  { %v732_v50 = vpop.f32.mrf.mxu1 }
 0xad5   :  { %v741_v51 = vand.u32 2147483647, %v732_v50  ;;  %v744_v53 = vsel %vm142_vm1, %v742_v49, -inf }
 0xad7   :  { %v743_v52 = vsel %vm142_vm1, %v741_v51, -inf }
 0xad8   :  { %v745_v54 = vmax.f32 %v743_v52, %v744_v53 }
 0xada   :  { %746 = vmax.xlane.f32.xlu0 %v745_v54 }
 0xb63   :  { %v747_v55 = vpop.xlane.xlu0 %746 }
 0xb64   :  { %v748_v56 = vrot.slane %v747_v55, 4 }
 0xb66   :  { %v749_v57 = vmax.f32 %v747_v55, %v748_v56 }
 0xb68   :  { %v750_v58 = vrot.slane %v749_v57, 2 }
 0xb6a   :  { %v751_v59 = vmax.f32 %v749_v57, %v750_v58 }
 0xb6c   :  { %v752_v60 = vrot.slane %v751_v59, 1 }
 0xb6e   :  { %v753_v61 = vmax.f32 %v751_v59, %v752_v60 }
 0xb70   :  { %4212 = vpush %v753_v61 }
 0xba1   :  { %s4213_s12 = spop %4212 }
 0xba2   :  { %s755_s13 = smax.f32 %s4448_s2, %s4213_s12 }
 0xba3   :  { %v756_v62 = vstv %s755_s13 }
 0xba4   :  { %4297 = vrcp.f32 %v756_v62 }
 0xbb1   :  { %v4298_v63 = vpop.eup %4297 }
 0xbb2   :  { %v759_v0 = vmul.f32 %v4298_v63, %v3996_v48  ;;  %v758_v1 = vmul.f32 %v4298_v63, %v732_v50 }
 0xbb4   :  { %3997 = vmatprep.subr.mxu0 %v759_v0  ;;  %4001 = vmatprep.mubr.msk.f32.mxu0 %vm142_vm1, %v758_v1 }
 0xbb5   :  { %3998 = vmatpush3.msra.mxu0 %v759_v0 }
 0xbb6   :  { %3999 = vmatprep.subr.mxu0 %v758_v1 }
 0xbb7   :  { %4000 = vmatpush3.msra.mxu0 %v758_v1  ;;  %v1274_v1 = vld [vmem:[#allocation5] sm:$0xff] }
 0xbb8   :  { %4002 = vmatmul.mubr.msk.f32.vlgmr.msra.gmra.mxu0 %vm142_vm1, %v759_v0  ;;  %v1275_v0 = vld [vmem:[#allocation5 + $0x8] sm:$0xff] }
 0xc78   :  { %v4003_v3 = vpop.f32.mrf.mxu0 }
 0xc79   :  { %v842_v5 = vand.u32 2147483647, %v4003_v3 }
 0xc7a   :  { %v832_v6 = vpop.f32.mrf.mxu0 }
 0xc7b   :  { %v841_v7 = vand.u32 2147483647, %v832_v6  ;;  %v844_v9 = vsel %vm142_vm1, %v842_v5, -inf }
 0xc7d   :  { %v843_v8 = vsel %vm142_vm1, %v841_v7, -inf }
 0xc7e   :  { %v845_v10 = vmax.f32 %v843_v8, %v844_v9 }
 0xc80   :  { %846 = vmax.xlane.f32.xlu1 %v845_v10 }
 0xd09   :  { %v847_v11 = vpop.xlane.xlu1 %846 }
 0xd0a   :  { %v848_v12 = vrot.slane %v847_v11, 4 }
 0xd0c   :  { %v849_v13 = vmax.f32 %v847_v11, %v848_v12 }
 0xd0e   :  { %v850_v14 = vrot.slane %v849_v13, 2 }
 0xd10   :  { %v851_v15 = vmax.f32 %v849_v13, %v850_v14 }
 0xd12   :  { %v852_v16 = vrot.slane %v851_v15, 1 }
 0xd14   :  { %v853_v17 = vmax.f32 %v851_v15, %v852_v16 }
 0xd16   :  { %4214 = vpush %v853_v17 }
 0xd47   :  { %s4215_s14 = spop %4214 }
 0xd48   :  { %s855_s15 = smax.f32 %s4448_s2, %s4215_s14 }
 0xd49   :  { %v856_v18 = vstv %s855_s15 }
 0xd4a   :  { %4299 = vrcp.f32 %v856_v18 }
 0xd57   :  { %v4300_v19 = vpop.eup %4299 }
 0xd58   :  { %v859_v20 = vmul.f32 %v4300_v19, %v4003_v3  ;;  %v858_v21 = vmul.f32 %v4300_v19, %v832_v6 }
 0xd5a   :  { %4004 = vmatprep.subr.mxu1 %v859_v20  ;;  %4008 = vmatprep.mubr.msk.f32.mxu1 %vm142_vm1, %v858_v21 }
 0xd5b   :  { %4005 = vmatpush3.msra.mxu1 %v859_v20 }
 0xd5c   :  { %4006 = vmatprep.subr.mxu1 %v858_v21 }
 0xd5d   :  { %4007 = vmatpush3.msra.mxu1 %v858_v21 }
 0xd5e   :  { %4009 = vmatmul.mubr.msk.f32.vlgmr.msra.gmra.mxu1 %vm142_vm1, %v859_v20 }
 0xe1e   :  { %v4010_v22 = vpop.f32.mrf.mxu1 }
 0xe1f   :  { %v942_v23 = vand.u32 2147483647, %v4010_v22 }
 0xe20   :  { %v932_v24 = vpop.f32.mrf.mxu1 }
 0xe21   :  { %v941_v25 = vand.u32 2147483647, %v932_v24  ;;  %v944_v27 = vsel %vm142_vm1, %v942_v23, -inf }
 0xe23   :  { %v943_v26 = vsel %vm142_vm1, %v941_v25, -inf }
 0xe24   :  { %v945_v28 = vmax.f32 %v943_v26, %v944_v27 }
 0xe26   :  { %946 = vmax.xlane.f32.xlu0 %v945_v28 }
 0xeaf   :  { %v947_v29 = vpop.xlane.xlu0 %946 }
 0xeb0   :  { %v948_v30 = vrot.slane %v947_v29, 4 }
 0xeb2   :  { %v949_v31 = vmax.f32 %v947_v29, %v948_v30 }
 0xeb4   :  { %v950_v32 = vrot.slane %v949_v31, 2 }
 0xeb6   :  { %v951_v33 = vmax.f32 %v949_v31, %v950_v32 }
 0xeb8   :  { %v952_v34 = vrot.slane %v951_v33, 1 }
 0xeba   :  { %v953_v35 = vmax.f32 %v951_v33, %v952_v34 }
 0xebc   :  { %4216 = vpush %v953_v35 }
 0xeed   :  { %s4217_s16 = spop %4216 }
 0xeee   :  { %s955_s17 = smax.f32 %s4448_s2, %s4217_s16 }
 0xeef   :  { %v956_v36 = vstv %s955_s17 }
 0xef0   :  { %4301 = vrcp.f32 %v956_v36 }
 0xefd   :  { %v4302_v37 = vpop.eup %4301 }
 0xefe   :  { %v959_v38 = vmul.f32 %v4302_v37, %v4010_v22  ;;  %v958_v39 = vmul.f32 %v4302_v37, %v932_v24 }
 0xf00   :  { %4011 = vmatprep.subr.mxu0 %v959_v38  ;;  %4015 = vmatprep.mubr.msk.f32.mxu0 %vm142_vm1, %v958_v39 }
 0xf01   :  { %4012 = vmatpush3.msra.mxu0 %v959_v38 }
 0xf02   :  { %4013 = vmatprep.subr.mxu0 %v958_v39 }
 0xf03   :  { %4014 = vmatpush3.msra.mxu0 %v958_v39 }
 0xf04   :  { %4016 = vmatmul.mubr.msk.f32.vlgmr.msra.gmra.mxu0 %vm142_vm1, %v959_v38 }
 0xf05   :  { %4029 = vmatprep.mubr.msk.f32.mxu0 %vm142_vm1, %v4488_v4 }
 0xfc4   :  { %v4017_v40 = vpop.f32.mrf.mxu0 }
 0xfc5   :  { %v1042_v41 = vand.u32 2147483647, %v4017_v40 }
 0xfc6   :  { %v1032_v42 = vpop.f32.mrf.mxu0 }
 0xfc7   :  { %v1041_v43 = vand.u32 2147483647, %v1032_v42  ;;  %v1044_v45 = vsel %vm142_vm1, %v1042_v41, -inf }
 0xfc9   :  { %v1043_v44 = vsel %vm142_vm1, %v1041_v43, -inf }
 0xfca   :  { %v1045_v46 = vmax.f32 %v1043_v44, %v1044_v45 }
 0xfcc   :  { %1046 = vmax.xlane.f32.xlu1 %v1045_v46 }
0x1055   :  { %v1047_v47 = vpop.xlane.xlu1 %1046 }
0x1056   :  { %v1048_v48 = vrot.slane %v1047_v47, 4 }
0x1058   :  { %v1049_v49 = vmax.f32 %v1047_v47, %v1048_v48 }
0x105a   :  { %v1050_v50 = vrot.slane %v1049_v49, 2 }
0x105c   :  { %v1051_v51 = vmax.f32 %v1049_v49, %v1050_v50 }
0x105e   :  { %v1052_v52 = vrot.slane %v1051_v51, 1 }
0x1060   :  { %v1053_v53 = vmax.f32 %v1051_v51, %v1052_v52 }
0x1062   :  { %4218 = vpush %v1053_v53 }
0x1093   :  { %s4219_s18 = spop %4218 }
0x1094   :  { %s1055_s19 = smax.f32 %s4448_s2, %s4219_s18 }
0x1095   :  { %v1056_v4 = vstv %s1055_s19 }
0x1096   :  { %4303 = vrcp.f32 %v1056_v4 }
0x10a3   :  { %v4304_v54 = vpop.eup %4303 }
0x10a4   :  { %v1059_v55 = vmul.f32 %v4304_v54, %v4017_v40  ;;  %v1058_v56 = vmul.f32 %v4304_v54, %v1032_v42 }
0x10a6   :  { %4018 = vmatprep.subr.mxu1 %v1059_v55  ;;  %4022 = vmatprep.mubr.msk.f32.mxu1 %vm142_vm1, %v1058_v56 }
0x10a7   :  { %4019 = vmatpush3.msra.mxu1 %v1059_v55 }
0x10a8   :  { %4020 = vmatprep.subr.mxu1 %v1058_v56 }
0x10a9   :  { %4021 = vmatpush3.msra.mxu1 %v1058_v56 }
0x10aa   :  { %4023 = vmatmul.mubr.msk.f32.vlgmr.msra.gmra.mxu1 %vm142_vm1, %v1059_v55  ;;  %4032 = vmatprep.subr.msk.mxu1 %vm58_vm0, %v1275_v0 }
0x10ab   :  { %4033 = vmatpush3.xpose.msk.msra.mxu1 %vm58_vm0, %v1275_v0  ;;  %4036 = vmatprep.mubr.msk.f32.mxu1 %vm58_vm0, %v1274_v1 }
0x10ac   :  { %4034 = vmatprep.subr.msk.mxu1 %vm58_vm0, %v1274_v1 }
0x10af   :  { %4035 = vmatpush3.xpose.msk.msra.mxu1 %vm58_vm0, %v1274_v1 }
0x10b2   :  { %4037 = vmatmul.mubr.msk.f32.vlgmr.msra.gmra.mxu1 %vm58_vm0, %v1275_v0 }
0x116a   :  { %v4024_v57 = vpop.f32.mrf.mxu1 }
0x116b   :  { %v1142_v58 = vand.u32 2147483647, %v4024_v57 }
0x116c   :  { %v1132_v59 = vpop.f32.mrf.mxu1 }
0x116d   :  { %v1141_v60 = vand.u32 2147483647, %v1132_v59  ;;  %v1144_v62 = vsel %vm142_vm1, %v1142_v58, -inf }
0x116f   :  { %v1143_v61 = vsel %vm142_vm1, %v1141_v60, -inf }
0x1170   :  { %v1145_v63 = vmax.f32 %v1143_v61, %v1144_v62 }
0x1172   :  { %1146 = vmax.xlane.f32.xlu0 %v1145_v63  ;;  %v4558_v20 = vpop.f32.mrf.mxu1 }
0x1173   :  { %v1358_v26 = vand.u32 2147483647, %v4558_v20 }
0x1174   :  { %v4560_v22 = vpop.f32.mrf.mxu1 }
0x1175   :  { %v1357_v27 = vand.u32 2147483647, %v4560_v22  ;;  %v1360_v31 = vsel %vm142_vm1, %v1358_v26, -inf }
0x11fb   :  { %v1147_v3 = vpop.xlane.xlu0 %1146 }
0x11fc   :  { %v1148_v5 = vrot.slane %v1147_v3, 4 }
0x11fe   :  { %v1149_v6 = vmax.f32 %v1147_v3, %v1148_v5 }
0x1200   :  { %v1150_v7 = vrot.slane %v1149_v6, 2 }
0x1202   :  { %v1151_v8 = vmax.f32 %v1149_v6, %v1150_v7 }
0x1204   :  { %v1152_v9 = vrot.slane %v1151_v8, 1 }
0x1206   :  { %v1153_v10 = vmax.f32 %v1151_v8, %v1152_v9 }
0x1208   :  { %4220 = vpush %v1153_v10 }
0x1239   :  { %s4221_s20 = spop %4220 }
0x123a   :  { %s1155_s21 = smax.f32 %s4448_s2, %s4221_s20 }
0x123b   :  { %v1156_v11 = vstv %s1155_s21 }
0x123c   :  { %4305 = vrcp.f32 %v1156_v11 }
0x1249   :  { %v4306_v12 = vpop.eup %4305 }
0x124a   :  { %v1159_v13 = vmul.f32 %v4306_v12, %v4024_v57  ;;  %v1158_v14 = vmul.f32 %v4306_v12, %v1132_v59 }
0x124c   :  { %4025 = vmatprep.subr.mxu0 %v1159_v13  ;;  %v1256_v15 = vmul.f32 %v1158_v14, %v1158_v14  ;;  %v1257_v16 = vmul.f32 %v1159_v13, %v1159_v13 }
0x124d   :  { %4026 = vmatpush3.msra.mxu0 %v1159_v13 }
0x124e   :  { %4027 = vmatprep.subr.mxu0 %v1158_v14  ;;  %v1258_v17 = vsel %vm142_vm1, %v1256_v15, 0.0  ;;  %v1259_v18 = vsel %vm142_vm1, %v1257_v16, 0.0 }
0x124f   :  { %4028 = vmatpush3.msra.mxu0 %v1158_v14  ;;  %v1260_v19 = vadd.f32 %v1259_v18, %v1258_v17 }
0x1250   :  { %4030 = vmatmul.mubr.msk.f32.vlgmr.msra.gmra.mxu0 %vm142_vm1, %v4485_v2  ;;  %v1359_v2 = vsel %vm142_vm1, %v1357_v27, -inf }
0x1251   :  { %1261 = vadd.xlane.f32.xlu0 %v1260_v19  ;;  %v1361_v32 = vmax.f32 %v1359_v2, %v1360_v31 }
0x12da   :  { %v1262_v33 = vpop.xlane.xlu0 %1261 }
0x12db   :  { %v1263_v34 = vrot.slane %v1262_v33, 4 }
0x12dd   :  { %v1264_v35 = vadd.f32 %v1263_v34, %v1262_v33 }
0x12df   :  { %v1265_v36 = vrot.slane %v1264_v35, 2 }
0x12e1   :  { %v1266_v41 = vadd.f32 %v1265_v36, %v1264_v35 }
0x12e3   :  { %v1267_v46 = vrot.slane %v1266_v41, 1 }
0x12e5   :  { %v1268_v51 = vadd.f32 %v1267_v46, %v1266_v41 }
0x1310   :  { %v4031_v21 = vpop.f32.mrf.mxu0 }
0x1311   :  { %v1242_v23 = vmul.f32 %v4031_v21, %v1159_v13 }
0x1312   :  { %v1232_v24 = vpop.f32.mrf.mxu0 }
0x1313   :  { %v1241_v25 = vmul.f32 %v1232_v24, %v1158_v14  ;;  %v1244_v29 = vsel %vm142_vm1, %v1242_v23, 0.0 }
0x1315   :  { %v1243_v28 = vsel %vm142_vm1, %v1241_v25, 0.0 }
0x1316   :  { %v1245_v30 = vadd.f32 %v1244_v29, %v1243_v28 }
0x1318   :  { %1246 = vadd.xlane.f32.xlu1 %v1245_v30 }
0x131c   :  { %1362 = vmax.xlane.f32.xlu1 %v1361_v32 }
0x13a1   :  { %v1247_v37 = vpop.xlane.xlu1 %1246 }
0x13a2   :  { %v1248_v38 = vrot.slane %v1247_v37, 4 }
0x13a4   :  { %v1249_v39 = vadd.f32 %v1248_v38, %v1247_v37 }
0x13a5   :  { %v1363_v40 = vpop.xlane.xlu1 %1362 }
0x13a6   :  { %v1250_v42 = vrot.slane %v1249_v39, 2  ;;  %v1364_v43 = vrot.slane %v1363_v40, 4 }
0x13a8   :  { %v1365_v44 = vmax.f32 %v1363_v40, %v1364_v43  ;;  %v1251_v45 = vadd.f32 %v1250_v42, %v1249_v39 }
0x13aa   :  { %v1366_v47 = vrot.slane %v1365_v44, 2  ;;  %v1252_v48 = vrot.slane %v1251_v45, 1 }
0x13ac   :  { %v1253_v49 = vadd.f32 %v1252_v48, %v1251_v45  ;;  %v1367_v50 = vmax.f32 %v1365_v44, %v1366_v47 }
0x13ae   :  { %4222 = vpush %v1253_v49  ;;  %v1368_v52 = vrot.slane %v1367_v50, 1 }
0x13af   :  { %4224 = vpush %v1268_v51 }
0x13b0   :  { %v1369_v53 = vmax.f32 %v1367_v50, %v1368_v52 }
0x13b2   :  { %4226 = vpush %v1369_v53 }
0x13df   :  { %s4223_s22 = spop %4222 }
0x13e0   :  { %s4225_s23 = spop %4224  ;;  %v1255_v57 = vstv %s4223_s22 }
0x13e1   :  { %v1270_v4 = vstv %s4225_s23 }
0x13e2   :  { %v1271_v54 = vadd.f32 1e-30, %v1270_v4 }
0x13e3   :  { %s4227_s24 = spop %4226 }
0x13e4   :  { %4307 = vrcp.f32 %v1271_v54  ;;  %s1371_s25 = smax.f32 %s4448_s2, %s4227_s24 }
0x13e5   :  { %v1372_v55 = vstv %s1371_s25 }
0x13e6   :  { %4309 = vrcp.f32 %v1372_v55 }
0x13f1   :  { %v4308_v56 = vpop.eup %4307 }
0x13f2   :  { %v4569_v58 = vmul.f32 %v4308_v56, %v1255_v57 }
0x13f3   :  { %v4310_v59 = vpop.eup %4309 }
0x13f4   :  { %v1375_v60 = vmul.f32 %v4310_v59, %v4558_v20  ;;  %v1374_v61 = vmul.f32 %v4310_v59, %v4560_v22 }
0x13f6   :  { %4039 = vmatprep.subr.mxu0 %v1375_v60  ;;  %4043 = vmatprep.mubr.msk.f32.mxu0 %vm142_vm1, %v1374_v61 }
0x13f7   :  { %4040 = vmatpush3.msra.mxu0 %v1375_v60 }
0x13f8   :  { %4041 = vmatprep.subr.mxu0 %v1374_v61 }
0x13f9   :  { %4042 = vmatpush3.msra.mxu0 %v1374_v61 }
0x13fa   :  { %4044 = vmatmul.mubr.msk.f32.vlgmr.msra.gmra.mxu0 %vm142_vm1, %v1375_v60 }
0x14ba   :  { %v4045_v62 = vpop.f32.mrf.mxu0 }
0x14bb   :  { %v1458_v63 = vand.u32 2147483647, %v4045_v62 }
0x14bc   :  { %v1448_v0 = vpop.f32.mrf.mxu0 }
0x14bd   :  { %v1457_v1 = vand.u32 2147483647, %v1448_v0  ;;  %v1460_v5 = vsel %vm142_vm1, %v1458_v63, -inf }
0x14bf   :  { %v1459_v3 = vsel %vm142_vm1, %v1457_v1, -inf }
0x14c0   :  { %v1461_v6 = vmax.f32 %v1459_v3, %v1460_v5 }
0x14c2   :  { %1462 = vmax.xlane.f32.xlu0 %v1461_v6 }
0x154b   :  { %v1463_v7 = vpop.xlane.xlu0 %1462 }
0x154c   :  { %v1464_v8 = vrot.slane %v1463_v7, 4 }
0x154e   :  { %v1465_v9 = vmax.f32 %v1463_v7, %v1464_v8 }
0x1550   :  { %v1466_v10 = vrot.slane %v1465_v9, 2 }
0x1552   :  { %v1467_v11 = vmax.f32 %v1465_v9, %v1466_v10 }
0x1554   :  { %v1468_v12 = vrot.slane %v1467_v11, 1 }
0x1556   :  { %v1469_v13 = vmax.f32 %v1467_v11, %v1468_v12 }
0x1558   :  { %4228 = vpush %v1469_v13 }
0x1589   :  { %s4229_s26 = spop %4228 }
0x158a   :  { %s1471_s1 = smax.f32 %s4448_s2, %s4229_s26 }
0x158b   :  { %v1472_v14 = vstv %s1471_s1 }
0x158c   :  { %4311 = vrcp.f32 %v1472_v14 }
0x1599   :  { %v4312_v15 = vpop.eup %4311 }
0x159a   :  { %v1475_v16 = vmul.f32 %v4312_v15, %v4045_v62  ;;  %v1474_v17 = vmul.f32 %v4312_v15, %v1448_v0 }
0x159c   :  { %4046 = vmatprep.subr.mxu0 %v1475_v16  ;;  %4050 = vmatprep.mubr.msk.f32.mxu0 %vm142_vm1, %v1474_v17 }
0x159d   :  { %4047 = vmatpush3.msra.mxu0 %v1475_v16 }
0x159e   :  { %4048 = vmatprep.subr.mxu0 %v1474_v17 }
0x159f   :  { %4049 = vmatpush3.msra.mxu0 %v1474_v17 }
0x15a0   :  { %4051 = vmatmul.mubr.msk.f32.vlgmr.msra.gmra.mxu0 %vm142_vm1, %v1475_v16 }
0x1660   :  { %v4052_v18 = vpop.f32.mrf.mxu0 }
0x1661   :  { %v1558_v19 = vand.u32 2147483647, %v4052_v18 }
0x1662   :  { %v1548_v21 = vpop.f32.mrf.mxu0 }
0x1663   :  { %v1557_v23 = vand.u32 2147483647, %v1548_v21  ;;  %v1560_v25 = vsel %vm142_vm1, %v1558_v19, -inf }
0x1665   :  { %v1559_v24 = vsel %vm142_vm1, %v1557_v23, -inf }
0x1666   :  { %v1561_v26 = vmax.f32 %v1559_v24, %v1560_v25 }
0x1668   :  { %1562 = vmax.xlane.f32.xlu1 %v1561_v26 }
0x16f1   :  { %v1563_v27 = vpop.xlane.xlu1 %1562 }
0x16f2   :  { %v1564_v28 = vrot.slane %v1563_v27, 4 }
0x16f4   :  { %v1565_v29 = vmax.f32 %v1563_v27, %v1564_v28 }
0x16f6   :  { %v1566_v30 = vrot.slane %v1565_v29, 2 }
0x16f8   :  { %v1567_v2 = vmax.f32 %v1565_v29, %v1566_v30 }
0x16fa   :  { %v1568_v31 = vrot.slane %v1567_v2, 1 }
0x16fc   :  { %v1569_v32 = vmax.f32 %v1567_v2, %v1568_v31 }
0x16fe   :  { %4230 = vpush %v1569_v32 }
0x172f   :  { %s4231_s27 = spop %4230 }
0x1730   :  { %s1571_s0 = smax.f32 %s4448_s2, %s4231_s27 }
0x1731   :  { %v1572_v33 = vstv %s1571_s0 }
0x1732   :  { %4313 = vrcp.f32 %v1572_v33 }
0x173f   :  { %v4314_v34 = vpop.eup %4313 }
0x1740   :  { %v1575_v35 = vmul.f32 %v4314_v34, %v4052_v18  ;;  %v1574_v36 = vmul.f32 %v4314_v34, %v1548_v21 }
0x1742   :  { %4053 = vmatprep.subr.mxu1 %v1575_v35  ;;  %4057 = vmatprep.mubr.msk.f32.mxu1 %vm142_vm1, %v1574_v36 }
0x1743   :  { %4054 = vmatpush3.msra.mxu1 %v1575_v35 }
0x1744   :  { %4055 = vmatprep.subr.mxu1 %v1574_v36 }
0x1745   :  { %4056 = vmatpush3.msra.mxu1 %v1574_v36 }
0x1746   :  { %4058 = vmatmul.mubr.msk.f32.vlgmr.msra.gmra.mxu1 %vm142_vm1, %v1575_v35 }
0x1806   :  { %v4059_v37 = vpop.f32.mrf.mxu1 }
0x1807   :  { %v1658_v38 = vand.u32 2147483647, %v4059_v37 }
0x1808   :  { %v1648_v39 = vpop.f32.mrf.mxu1 }
0x1809   :  { %v1657_v40 = vand.u32 2147483647, %v1648_v39  ;;  %v1660_v42 = vsel %vm142_vm1, %v1658_v38, -inf }
0x180b   :  { %v1659_v41 = vsel %vm142_vm1, %v1657_v40, -inf }
0x180c   :  { %v1661_v43 = vmax.f32 %v1659_v41, %v1660_v42 }
0x180e   :  { %1662 = vmax.xlane.f32.xlu0 %v1661_v43 }
0x1897   :  { %v1663_v44 = vpop.xlane.xlu0 %1662 }
0x1898   :  { %v1664_v45 = vrot.slane %v1663_v44, 4 }
0x189a   :  { %v1665_v46 = vmax.f32 %v1663_v44, %v1664_v45 }
0x189c   :  { %v1666_v47 = vrot.slane %v1665_v46, 2 }
0x189e   :  { %v1667_v48 = vmax.f32 %v1665_v46, %v1666_v47 }
0x18a0   :  { %v1668_v49 = vrot.slane %v1667_v48, 1 }
0x18a2   :  { %v1669_v50 = vmax.f32 %v1667_v48, %v1668_v49 }
0x18a4   :  { %4232 = vpush %v1669_v50 }
0x18d5   :  { %s4233_s28 = spop %4232 }
0x18d6   :  { %s1671_s29 = smax.f32 %s4448_s2, %s4233_s28 }
0x18d7   :  { %v1672_v51 = vstv %s1671_s29 }
0x18d8   :  { %4315 = vrcp.f32 %v1672_v51 }
0x18e5   :  { %v4316_v52 = vpop.eup %4315 }
0x18e6   :  { %v1675_v53 = vmul.f32 %v4316_v52, %v4059_v37  ;;  %v1674_v4 = vmul.f32 %v4316_v52, %v1648_v39 }
0x18e8   :  { %4060 = vmatprep.subr.mxu0 %v1675_v53  ;;  %4064 = vmatprep.mubr.msk.f32.mxu0 %vm142_vm1, %v1674_v4 }
0x18e9   :  { %4061 = vmatpush3.msra.mxu0 %v1675_v53 }
0x18ea   :  { %4062 = vmatprep.subr.mxu0 %v1674_v4 }
0x18eb   :  { %4063 = vmatpush3.msra.mxu0 %v1674_v4 }
0x18ec   :  { %4065 = vmatmul.mubr.msk.f32.vlgmr.msra.gmra.mxu0 %vm142_vm1, %v1675_v53 }
0x19ac   :  { %v4066_v54 = vpop.f32.mrf.mxu0 }
0x19ad   :  { %v1758_v55 = vand.u32 2147483647, %v4066_v54 }
0x19ae   :  { %v1748_v56 = vpop.f32.mrf.mxu0 }
0x19af   :  { %v1757_v57 = vand.u32 2147483647, %v1748_v56  ;;  %v1760_v60 = vsel %vm142_vm1, %v1758_v55, -inf }
0x19b1   :  { %v1759_v59 = vsel %vm142_vm1, %v1757_v57, -inf }
0x19b2   :  { %v1761_v61 = vmax.f32 %v1759_v59, %v1760_v60 }
0x19b4   :  { %1762 = vmax.xlane.f32.xlu1 %v1761_v61 }
0x1a3d   :  { %v1763_v62 = vpop.xlane.xlu1 %1762 }
0x1a3e   :  { %v1764_v63 = vrot.slane %v1763_v62, 4 }
0x1a40   :  { %v1765_v0 = vmax.f32 %v1763_v62, %v1764_v63 }
0x1a42   :  { %v1766_v1 = vrot.slane %v1765_v0, 2 }
0x1a44   :  { %v1767_v3 = vmax.f32 %v1765_v0, %v1766_v1 }
0x1a46   :  { %v1768_v5 = vrot.slane %v1767_v3, 1 }
0x1a48   :  { %v1769_v6 = vmax.f32 %v1767_v3, %v1768_v5 }
0x1a4a   :  { %4234 = vpush %v1769_v6 }
0x1a7b   :  { %s4235_s30 = spop %4234 }
0x1a7c   :  { %s1771_s4 = smax.f32 %s4448_s2, %s4235_s30 }
0x1a7d   :  { %v1772_v7 = vstv %s1771_s4 }
0x1a7e   :  { %4317 = vrcp.f32 %v1772_v7 }
0x1a8b   :  { %v4318_v8 = vpop.eup %4317 }
0x1a8c   :  { %v1775_v9 = vmul.f32 %v4318_v8, %v4066_v54  ;;  %v1774_v10 = vmul.f32 %v4318_v8, %v1748_v56 }
0x1a8e   :  { %4067 = vmatprep.subr.mxu1 %v1775_v9  ;;  %4071 = vmatprep.mubr.msk.f32.mxu1 %vm142_vm1, %v1774_v10 }
0x1a8f   :  { %4068 = vmatpush3.msra.mxu1 %v1775_v9 }
0x1a90   :  { %4069 = vmatprep.subr.mxu1 %v1774_v10 }
0x1a91   :  { %4070 = vmatpush3.msra.mxu1 %v1774_v10 }
0x1a92   :  { %4072 = vmatmul.mubr.msk.f32.vlgmr.msra.gmra.mxu1 %vm142_vm1, %v1775_v9 }
0x1b52   :  { %v4073_v11 = vpop.f32.mrf.mxu1 }
0x1b53   :  { %v1858_v12 = vand.u32 2147483647, %v4073_v11 }
0x1b54   :  { %v1848_v13 = vpop.f32.mrf.mxu1 }
0x1b55   :  { %v1857_v14 = vand.u32 2147483647, %v1848_v13  ;;  %v1860_v16 = vsel %vm142_vm1, %v1858_v12, -inf }
0x1b57   :  { %v1859_v15 = vsel %vm142_vm1, %v1857_v14, -inf }
0x1b58   :  { %v1861_v17 = vmax.f32 %v1859_v15, %v1860_v16 }
0x1b5a   :  { %1862 = vmax.xlane.f32.xlu0 %v1861_v17 }
0x1be3   :  { %v1863_v18 = vpop.xlane.xlu0 %1862 }
0x1be4   :  { %v1864_v19 = vrot.slane %v1863_v18, 4 }
0x1be6   :  { %v1865_v21 = vmax.f32 %v1863_v18, %v1864_v19 }
0x1be8   :  { %v1866_v23 = vrot.slane %v1865_v21, 2 }
0x1bea   :  { %v1867_v24 = vmax.f32 %v1865_v21, %v1866_v23 }
0x1bec   :  { %v1868_v25 = vrot.slane %v1867_v24, 1 }
0x1bee   :  { %v1869_v26 = vmax.f32 %v1867_v24, %v1868_v25 }
0x1bf0   :  { %4236 = vpush %v1869_v26 }
0x1c21   :  { %s4237_s5 = spop %4236 }
0x1c22   :  { %s1871_s6 = smax.f32 %s4448_s2, %s4237_s5 }
0x1c23   :  { %v1872_v27 = vstv %s1871_s6 }
0x1c24   :  { %4319 = vrcp.f32 %v1872_v27 }
0x1c31   :  { %v4320_v28 = vpop.eup %4319 }
0x1c32   :  { %v1875_v29 = vmul.f32 %v4320_v28, %v4073_v11  ;;  %v1874_v30 = vmul.f32 %v4320_v28, %v1848_v13 }
0x1c34   :  { %4074 = vmatprep.subr.mxu0 %v1875_v29  ;;  %4078 = vmatprep.mubr.msk.f32.mxu0 %vm142_vm1, %v1874_v30 }
0x1c35   :  { %4075 = vmatpush3.msra.mxu0 %v1875_v29 }
0x1c36   :  { %4076 = vmatprep.subr.mxu0 %v1874_v30 }
0x1c37   :  { %4077 = vmatpush3.msra.mxu0 %v1874_v30 }
0x1c38   :  { %4079 = vmatmul.mubr.msk.f32.vlgmr.msra.gmra.mxu0 %vm142_vm1, %v1875_v29 }
0x1cf8   :  { %v4080_v2 = vpop.f32.mrf.mxu0 }
0x1cf9   :  { %v1958_v31 = vand.u32 2147483647, %v4080_v2 }
0x1cfa   :  { %v1948_v32 = vpop.f32.mrf.mxu0 }
0x1cfb   :  { %v1957_v33 = vand.u32 2147483647, %v1948_v32  ;;  %v1960_v35 = vsel %vm142_vm1, %v1958_v31, -inf }
0x1cfd   :  { %v1959_v34 = vsel %vm142_vm1, %v1957_v33, -inf }
0x1cfe   :  { %v1961_v36 = vmax.f32 %v1959_v34, %v1960_v35 }
0x1d00   :  { %1962 = vmax.xlane.f32.xlu1 %v1961_v36 }
0x1d89   :  { %v1963_v37 = vpop.xlane.xlu1 %1962 }
0x1d8a   :  { %v1964_v38 = vrot.slane %v1963_v37, 4 }
0x1d8c   :  { %v1965_v39 = vmax.f32 %v1963_v37, %v1964_v38 }
0x1d8e   :  { %v1966_v40 = vrot.slane %v1965_v39, 2 }
0x1d90   :  { %v1967_v41 = vmax.f32 %v1965_v39, %v1966_v40 }
0x1d92   :  { %v1968_v42 = vrot.slane %v1967_v41, 1 }
0x1d94   :  { %v1969_v43 = vmax.f32 %v1967_v41, %v1968_v42 }
0x1d96   :  { %4238 = vpush %v1969_v43 }
0x1dc7   :  { %s4239_s7 = spop %4238 }
0x1dc8   :  { %s1971_s8 = smax.f32 %s4448_s2, %s4239_s7 }
0x1dc9   :  { %v1972_v44 = vstv %s1971_s8 }
0x1dca   :  { %4321 = vrcp.f32 %v1972_v44 }
0x1dd7   :  { %v4322_v45 = vpop.eup %4321 }
0x1dd8   :  { %v1975_v46 = vmul.f32 %v4322_v45, %v4080_v2  ;;  %v1974_v47 = vmul.f32 %v4322_v45, %v1948_v32 }
0x1dda   :  { %4081 = vmatprep.subr.mxu1 %v1975_v46  ;;  %4085 = vmatprep.mubr.msk.f32.mxu1 %vm142_vm1, %v1974_v47 }
0x1ddb   :  { %4082 = vmatpush3.msra.mxu1 %v1975_v46 }
0x1ddc   :  { %4083 = vmatprep.subr.mxu1 %v1974_v47 }
0x1ddd   :  { %4084 = vmatpush3.msra.mxu1 %v1974_v47  ;;  %v2492_v47 = vld [vmem:[#allocation7 + $0x8] sm:$0xff] }
0x1dde   :  { %4086 = vmatmul.mubr.msk.f32.vlgmr.msra.gmra.mxu1 %vm142_vm1, %v1975_v46 }
0x1e9e   :  { %v4087_v48 = vpop.f32.mrf.mxu1 }
0x1e9f   :  { %v2058_v49 = vand.u32 2147483647, %v4087_v48 }
0x1ea0   :  { %v2048_v50 = vpop.f32.mrf.mxu1 }
0x1ea1   :  { %v2057_v51 = vand.u32 2147483647, %v2048_v50  ;;  %v2060_v53 = vsel %vm142_vm1, %v2058_v49, -inf }
0x1ea3   :  { %v2059_v52 = vsel %vm142_vm1, %v2057_v51, -inf }
0x1ea4   :  { %v2061_v4 = vmax.f32 %v2059_v52, %v2060_v53 }
0x1ea6   :  { %2062 = vmax.xlane.f32.xlu0 %v2061_v4 }
0x1f2f   :  { %v2063_v54 = vpop.xlane.xlu0 %2062 }
0x1f30   :  { %v2064_v55 = vrot.slane %v2063_v54, 4 }
0x1f32   :  { %v2065_v56 = vmax.f32 %v2063_v54, %v2064_v55 }
0x1f34   :  { %v2066_v57 = vrot.slane %v2065_v56, 2 }
0x1f36   :  { %v2067_v59 = vmax.f32 %v2065_v56, %v2066_v57 }
0x1f38   :  { %v2068_v60 = vrot.slane %v2067_v59, 1 }
0x1f3a   :  { %v2069_v61 = vmax.f32 %v2067_v59, %v2068_v60 }
0x1f3c   :  { %4240 = vpush %v2069_v61 }
0x1f6d   :  { %s4241_s9 = spop %4240 }
0x1f6e   :  { %s2071_s10 = smax.f32 %s4448_s2, %s4241_s9 }
0x1f6f   :  { %v2072_v62 = vstv %s2071_s10 }
0x1f70   :  { %4323 = vrcp.f32 %v2072_v62 }
0x1f7d   :  { %v4324_v63 = vpop.eup %4323 }
0x1f7e   :  { %v2075_v0 = vmul.f32 %v4324_v63, %v4087_v48  ;;  %v2074_v1 = vmul.f32 %v4324_v63, %v2048_v50  ;;  %v2491_v48 = vld [vmem:[#allocation7] sm:$0xff] }
0x1f80   :  { %4088 = vmatprep.subr.mxu0 %v2075_v0  ;;  %4092 = vmatprep.mubr.msk.f32.mxu0 %vm142_vm1, %v2074_v1 }
0x1f81   :  { %4089 = vmatpush3.msra.mxu0 %v2075_v0 }
0x1f82   :  { %4090 = vmatprep.subr.mxu0 %v2074_v1 }
0x1f83   :  { %4091 = vmatpush3.msra.mxu0 %v2074_v1 }
0x1f84   :  { %4093 = vmatmul.mubr.msk.f32.vlgmr.msra.gmra.mxu0 %vm142_vm1, %v2075_v0 }
0x2044   :  { %v4094_v3 = vpop.f32.mrf.mxu0 }
0x2045   :  { %v2158_v5 = vand.u32 2147483647, %v4094_v3 }
0x2046   :  { %v2148_v6 = vpop.f32.mrf.mxu0 }
0x2047   :  { %v2157_v7 = vand.u32 2147483647, %v2148_v6  ;;  %v2160_v9 = vsel %vm142_vm1, %v2158_v5, -inf }
0x2049   :  { %v2159_v8 = vsel %vm142_vm1, %v2157_v7, -inf }
0x204a   :  { %v2161_v10 = vmax.f32 %v2159_v8, %v2160_v9 }
0x204c   :  { %2162 = vmax.xlane.f32.xlu1 %v2161_v10 }
0x20d5   :  { %v2163_v11 = vpop.xlane.xlu1 %2162 }
0x20d6   :  { %v2164_v12 = vrot.slane %v2163_v11, 4 }
0x20d8   :  { %v2165_v13 = vmax.f32 %v2163_v11, %v2164_v12 }
0x20da   :  { %v2166_v14 = vrot.slane %v2165_v13, 2 }
0x20dc   :  { %v2167_v15 = vmax.f32 %v2165_v13, %v2166_v14 }
0x20de   :  { %v2168_v16 = vrot.slane %v2167_v15, 1 }
0x20e0   :  { %v2169_v17 = vmax.f32 %v2167_v15, %v2168_v16 }
0x20e2   :  { %4242 = vpush %v2169_v17 }
0x2113   :  { %s4243_s11 = spop %4242 }
0x2114   :  { %s2171_s12 = smax.f32 %s4448_s2, %s4243_s11 }
0x2115   :  { %v2172_v18 = vstv %s2171_s12 }
0x2116   :  { %4325 = vrcp.f32 %v2172_v18 }
0x2123   :  { %v4326_v19 = vpop.eup %4325 }
0x2124   :  { %v2175_v21 = vmul.f32 %v4326_v19, %v4094_v3  ;;  %v2174_v23 = vmul.f32 %v4326_v19, %v2148_v6 }
0x2126   :  { %4095 = vmatprep.subr.mxu1 %v2175_v21  ;;  %4099 = vmatprep.mubr.msk.f32.mxu1 %vm142_vm1, %v2174_v23 }
0x2127   :  { %4096 = vmatpush3.msra.mxu1 %v2175_v21 }
0x2128   :  { %4097 = vmatprep.subr.mxu1 %v2174_v23 }
0x2129   :  { %4098 = vmatpush3.msra.mxu1 %v2174_v23 }
0x212a   :  { %4100 = vmatmul.mubr.msk.f32.vlgmr.msra.gmra.mxu1 %vm142_vm1, %v2175_v21 }
0x212b   :  { %4113 = vmatprep.mubr.msk.f32.mxu1 %vm142_vm1, %v4560_v22 }
0x21ea   :  { %v4101_v24 = vpop.f32.mrf.mxu1 }
0x21eb   :  { %v2258_v25 = vand.u32 2147483647, %v4101_v24 }
0x21ec   :  { %v2248_v26 = vpop.f32.mrf.mxu1 }
0x21ed   :  { %v2257_v27 = vand.u32 2147483647, %v2248_v26  ;;  %v2260_v29 = vsel %vm142_vm1, %v2258_v25, -inf }
0x21ef   :  { %v2259_v28 = vsel %vm142_vm1, %v2257_v27, -inf }
0x21f0   :  { %v2261_v30 = vmax.f32 %v2259_v28, %v2260_v29 }
0x21f2   :  { %2262 = vmax.xlane.f32.xlu0 %v2261_v30 }
0x227b   :  { %v2263_v2 = vpop.xlane.xlu0 %2262 }
0x227c   :  { %v2264_v31 = vrot.slane %v2263_v2, 4 }
0x227e   :  { %v2265_v32 = vmax.f32 %v2263_v2, %v2264_v31 }
0x2280   :  { %v2266_v33 = vrot.slane %v2265_v32, 2 }
0x2282   :  { %v2267_v34 = vmax.f32 %v2265_v32, %v2266_v33 }
0x2284   :  { %v2268_v35 = vrot.slane %v2267_v34, 1 }
0x2286   :  { %v2269_v36 = vmax.f32 %v2267_v34, %v2268_v35 }
0x2288   :  { %4244 = vpush %v2269_v36 }
0x22b9   :  { %s4245_s13 = spop %4244 }
0x22ba   :  { %s2271_s14 = smax.f32 %s4448_s2, %s4245_s13  ;;  %s4449_s13 = smov [#allocation8]  }
0x22bb   :  { %v2272_v22 = vstv %s2271_s14  ;;  %s3716_s14 = sshll.u32 %s4449_s13, 4  ;;  %s3717_s14 = int_to_ptr.vmem [resolvable:$true] %s3716_s14 }
0x22bc   :  { %4327 = vrcp.f32 %v2272_v22  ;;  %p4422_p2 = scmp.lt.s32.totalorder %s3717_s14, %s3717_s14 }
0x22c9   :  { %v4328_v37 = vpop.eup %4327 }
0x22ca   :  { %v2275_v38 = vmul.f32 %v4328_v37, %v4101_v24  ;;  %v2274_v39 = vmul.f32 %v4328_v37, %v2248_v26 }
0x22cc   :  { %4102 = vmatprep.subr.mxu0 %v2275_v38  ;;  %4106 = vmatprep.mubr.msk.f32.mxu0 %vm142_vm1, %v2274_v39 }
0x22cd   :  { %4103 = vmatpush3.msra.mxu0 %v2275_v38 }
0x22ce   :  { %4104 = vmatprep.subr.mxu0 %v2274_v39 }
0x22cf   :  { %4105 = vmatpush3.msra.mxu0 %v2274_v39 }
0x22d0   :  { %4107 = vmatmul.mubr.msk.f32.vlgmr.msra.gmra.mxu0 %vm142_vm1, %v2275_v38  ;;  %4116 = vmatprep.subr.msk.mxu0 %vm58_vm0, %v2492_v47 }
0x22d1   :  { %4117 = vmatpush3.xpose.msk.msra.mxu0 %vm58_vm0, %v2492_v47  ;;  %4120 = vmatprep.mubr.msk.f32.mxu0 %vm58_vm0, %v2491_v48 }
0x22d2   :  { %4118 = vmatprep.subr.msk.mxu0 %vm58_vm0, %v2491_v48 }
0x22d5   :  { %4119 = vmatpush3.xpose.msk.msra.mxu0 %vm58_vm0, %v2491_v48 }
0x22d8   :  { %4121 = vmatmul.mubr.msk.f32.vlgmr.msra.gmra.mxu0 %vm58_vm0, %v2492_v47 }
0x2390   :  { %v4108_v40 = vpop.f32.mrf.mxu0 }
0x2391   :  { %v2358_v41 = vand.u32 2147483647, %v4108_v40 }
0x2392   :  { %v2348_v42 = vpop.f32.mrf.mxu0 }
0x2393   :  { %v2357_v43 = vand.u32 2147483647, %v2348_v42  ;;  %v2360_v45 = vsel %vm142_vm1, %v2358_v41, -inf }
0x2395   :  { %v2359_v44 = vsel %vm142_vm1, %v2357_v43, -inf }
0x2396   :  { %v2361_v46 = vmax.f32 %v2359_v44, %v2360_v45 }
0x2398   :  { %2362 = vmax.xlane.f32.xlu1 %v2361_v46  ;;  %v4635_v1 = vpop.f32.mrf.mxu0 }
0x2399   :  { %v2575_v9 = vand.u32 2147483647, %v4635_v1 }
0x239a   :  { %v4637_v5 = vpop.f32.mrf.mxu0 }
0x239b   :  { %v2574_v10 = vand.u32 2147483647, %v4637_v5  ;;  %v2577_v14 = vsel %vm142_vm1, %v2575_v9, -inf }
0x2421   :  { %v2363_v49 = vpop.xlane.xlu1 %2362 }
0x2422   :  { %v2364_v50 = vrot.slane %v2363_v49, 4 }
0x2424   :  { %v2365_v51 = vmax.f32 %v2363_v49, %v2364_v50 }
0x2426   :  { %v2366_v52 = vrot.slane %v2365_v51, 2 }
0x2428   :  { %v2367_v53 = vmax.f32 %v2365_v51, %v2366_v52 }
0x242a   :  { %v2368_v4 = vrot.slane %v2367_v53, 1 }
0x242c   :  { %v2369_v54 = vmax.f32 %v2367_v53, %v2368_v4 }
0x242e   :  { %4246 = vpush %v2369_v54 }
0x245f   :  { %s4247_s15 = spop %4246 }
0x2460   :  { %s2371_s16 = smax.f32 %s4448_s2, %s4247_s15  ;;  %s4417_s15 = scalar_lea.vmem %s3717_s14, 16 }
0x2461   :  { %v2372_v55 = vstv %s2371_s16  ;;  %p4418_p1 = scmp.ne.s32.totalorder %s3717_s14, %s4417_s15  ;;  %s4421_s16 = scalar_lea.vmem %s3717_s14, 32 }
0x2462   :  { %4329 = vrcp.f32 %v2372_v55  ;;  %p4423_p3 = scmp.lt.s32.totalorder %s4421_s16, %s4417_s15 }
0x2464   :  { %p4424_p4 = por %p4423_p3, %p4422_p2 }
0x2466   :  { %p4425_p5 = pnand %p4424_p4, %p4418_p1 }
0x246f   :  { %v4330_v56 = vpop.eup %4329 }
0x2470   :  { %v2375_v57 = vmul.f32 %v4330_v56, %v4108_v40  ;;  %v2374_v59 = vmul.f32 %v4330_v56, %v2348_v42 }
0x2472   :  { %4109 = vmatprep.subr.mxu1 %v2375_v57  ;;  %v2472_v60 = vmul.f32 %v2374_v59, %v2374_v59  ;;  %v2473_v61 = vmul.f32 %v2375_v57, %v2375_v57 }
0x2473   :  { %4110 = vmatpush3.msra.mxu1 %v2375_v57 }
0x2474   :  { %4111 = vmatprep.subr.mxu1 %v2374_v59  ;;  %v2474_v62 = vsel %vm142_vm1, %v2472_v60, 0.0  ;;  %v2475_v63 = vsel %vm142_vm1, %v2473_v61, 0.0 }
0x2475   :  { %4112 = vmatpush3.msra.mxu1 %v2374_v59  ;;  %v2476_v0 = vadd.f32 %v2475_v63, %v2474_v62 }
0x2476   :  { %4114 = vmatmul.mubr.msk.f32.vlgmr.msra.gmra.mxu1 %vm142_vm1, %v4558_v20  ;;  %v2576_v20 = vsel %vm142_vm1, %v2574_v10, -inf }
0x2477   :  { %2477 = vadd.xlane.f32.xlu1 %v2476_v0  ;;  %v2578_v15 = vmax.f32 %v2576_v20, %v2577_v14 }
0x2500   :  { %v2478_v16 = vpop.xlane.xlu1 %2477 }
0x2501   :  { %v2479_v17 = vrot.slane %v2478_v16, 4 }
0x2503   :  { %v2480_v18 = vadd.f32 %v2479_v17, %v2478_v16 }
0x2505   :  { %v2481_v19 = vrot.slane %v2480_v18, 2 }
0x2507   :  { %v2482_v26 = vadd.f32 %v2481_v19, %v2480_v18 }
0x2509   :  { %v2483_v2 = vrot.slane %v2482_v26, 1 }
0x250b   :  { %v2484_v35 = vadd.f32 %v2483_v2, %v2482_v26 }
0x2536   :  { %v4115_v3 = vpop.f32.mrf.mxu1 }
0x2537   :  { %v2458_v6 = vmul.f32 %v4115_v3, %v2375_v57 }
0x2538   :  { %v2448_v7 = vpop.f32.mrf.mxu1 }
0x2539   :  { %v2457_v8 = vmul.f32 %v2448_v7, %v2374_v59  ;;  %v2460_v12 = vsel %vm142_vm1, %v2458_v6, 0.0 }
0x253b   :  { %v2459_v11 = vsel %vm142_vm1, %v2457_v8, 0.0 }
0x253c   :  { %v2461_v13 = vadd.f32 %v2460_v12, %v2459_v11 }
0x253e   :  { %2462 = vadd.xlane.f32.xlu0 %v2461_v13 }
0x2542   :  { %2579 = vmax.xlane.f32.xlu0 %v2578_v15 }
0x25c7   :  { %v2463_v21 = vpop.xlane.xlu0 %2462 }
0x25c8   :  { %v2464_v23 = vrot.slane %v2463_v21, 4 }
0x25ca   :  { %v2465_v24 = vadd.f32 %v2464_v23, %v2463_v21 }
0x25cb   :  { %v2580_v25 = vpop.xlane.xlu0 %2579 }
0x25cc   :  { %v2466_v27 = vrot.slane %v2465_v24, 2  ;;  %v2581_v28 = vrot.slane %v2580_v25, 4 }
0x25ce   :  { %v2582_v29 = vmax.f32 %v2580_v25, %v2581_v28  ;;  %v2467_v30 = vadd.f32 %v2466_v27, %v2465_v24 }
0x25d0   :  { %v2583_v31 = vrot.slane %v2582_v29, 2  ;;  %v2468_v32 = vrot.slane %v2467_v30, 1 }
0x25d2   :  { %v2469_v33 = vadd.f32 %v2468_v32, %v2467_v30  ;;  %v2584_v34 = vmax.f32 %v2582_v29, %v2583_v31 }
0x25d4   :  { %4248 = vpush %v2469_v33  ;;  %v2585_v36 = vrot.slane %v2584_v34, 1 }
0x25d5   :  { %4250 = vpush %v2484_v35 }
0x25d6   :  { %v2586_v22 = vmax.f32 %v2584_v34, %v2585_v36 }
0x25d8   :  { %4252 = vpush %v2586_v22 }
0x2605   :  { %s4249_s17 = spop %4248 }
0x2606   :  { %s4251_s18 = spop %4250  ;;  %v2471_v41 = vstv %s4249_s17 }
0x2607   :  { %v2486_v37 = vstv %s4251_s18 }
0x2608   :  { %v2487_v38 = vadd.f32 1e-30, %v2486_v37 }
0x2609   :  { %s4253_s19 = spop %4252 }
0x260a   :  { %4331 = vrcp.f32 %v2487_v38  ;;  %s2588_s20 = smax.f32 %s4448_s2, %s4253_s19 }
0x260b   :  { %v2589_v39 = vstv %s2588_s20 }
0x260c   :  { %4333 = vrcp.f32 %v2589_v39 }
0x2617   :  { %v4332_v40 = vpop.eup %4331 }
0x2618   :  { %v2489_v42 = vmul.f32 %v4332_v40, %v2471_v41 }
0x2619   :  { %v4334_v43 = vpop.eup %4333 }
0x261a   :  { %v2592_v44 = vmul.f32 %v4334_v43, %v4635_v1  ;;  %v2591_v45 = vmul.f32 %v4334_v43, %v4637_v5  ;;  %v4649_v46 = vadd.f32 %v2489_v42, %v4569_v58 }
0x261c   :  { %4123 = vmatprep.subr.mxu1 %v2592_v44  ;;  %4127 = vmatprep.mubr.msk.f32.mxu1 %vm142_vm1, %v2591_v45 }
0x261d   :  { %4124 = vmatpush3.msra.mxu1 %v2592_v44 }
0x261e   :  { %4125 = vmatprep.subr.mxu1 %v2591_v45 }
0x261f   :  { %4126 = vmatpush3.msra.mxu1 %v2591_v45 }
0x2620   :  { %4128 = vmatmul.mubr.msk.f32.vlgmr.msra.gmra.mxu1 %vm142_vm1, %v2592_v44 }
0x26e0   :  { %v4129_v47 = vpop.f32.mrf.mxu1 }
0x26e1   :  { %v2675_v48 = vand.u32 2147483647, %v4129_v47 }
0x26e2   :  { %v2665_v49 = vpop.f32.mrf.mxu1 }
0x26e3   :  { %v2674_v50 = vand.u32 2147483647, %v2665_v49  ;;  %v2677_v52 = vsel %vm142_vm1, %v2675_v48, -inf }
0x26e5   :  { %v2676_v51 = vsel %vm142_vm1, %v2674_v50, -inf }
0x26e6   :  { %v2678_v53 = vmax.f32 %v2676_v51, %v2677_v52 }
0x26e8   :  { %2679 = vmax.xlane.f32.xlu1 %v2678_v53 }
0x2771   :  { %v2680_v58 = vpop.xlane.xlu1 %2679 }
0x2772   :  { %v2681_v4 = vrot.slane %v2680_v58, 4 }
0x2774   :  { %v2682_v54 = vmax.f32 %v2680_v58, %v2681_v4 }
0x2776   :  { %v2683_v55 = vrot.slane %v2682_v54, 2 }
0x2778   :  { %v2684_v56 = vmax.f32 %v2682_v54, %v2683_v55 }
0x277a   :  { %v2685_v57 = vrot.slane %v2684_v56, 1 }
0x277c   :  { %v2686_v59 = vmax.f32 %v2684_v56, %v2685_v57 }
0x277e   :  { %4254 = vpush %v2686_v59 }
0x27af   :  { %s4255_s21 = spop %4254 }
0x27b0   :  { %s2688_s22 = smax.f32 %s4448_s2, %s4255_s21 }
0x27b1   :  { %v2689_v60 = vstv %s2688_s22 }
0x27b2   :  { %4335 = vrcp.f32 %v2689_v60 }
0x27bf   :  { %v4336_v61 = vpop.eup %4335 }
0x27c0   :  { %v2692_v62 = vmul.f32 %v4336_v61, %v4129_v47  ;;  %v2691_v63 = vmul.f32 %v4336_v61, %v2665_v49 }
0x27c2   :  { %4130 = vmatprep.subr.mxu1 %v2692_v62  ;;  %4134 = vmatprep.mubr.msk.f32.mxu1 %vm142_vm1, %v2691_v63 }
0x27c3   :  { %4131 = vmatpush3.msra.mxu1 %v2692_v62 }
0x27c4   :  { %4132 = vmatprep.subr.mxu1 %v2691_v63 }
0x27c5   :  { %4133 = vmatpush3.msra.mxu1 %v2691_v63 }
0x27c6   :  { %4135 = vmatmul.mubr.msk.f32.vlgmr.msra.gmra.mxu1 %vm142_vm1, %v2692_v62 }
0x2886   :  { %v4136_v0 = vpop.f32.mrf.mxu1 }
0x2887   :  { %v2775_v3 = vand.u32 2147483647, %v4136_v0 }
0x2888   :  { %v2765_v6 = vpop.f32.mrf.mxu1 }
0x2889   :  { %v2774_v7 = vand.u32 2147483647, %v2765_v6  ;;  %v2777_v9 = vsel %vm142_vm1, %v2775_v3, -inf }
0x288b   :  { %v2776_v8 = vsel %vm142_vm1, %v2774_v7, -inf }
0x288c   :  { %v2778_v10 = vmax.f32 %v2776_v8, %v2777_v9 }
0x288e   :  { %2779 = vmax.xlane.f32.xlu0 %v2778_v10 }
0x2917   :  { %v2780_v11 = vpop.xlane.xlu0 %2779 }
0x2918   :  { %v2781_v12 = vrot.slane %v2780_v11, 4 }
0x291a   :  { %v2782_v13 = vmax.f32 %v2780_v11, %v2781_v12 }
0x291c   :  { %v2783_v20 = vrot.slane %v2782_v13, 2 }
0x291e   :  { %v2784_v14 = vmax.f32 %v2782_v13, %v2783_v20 }
0x2920   :  { %v2785_v15 = vrot.slane %v2784_v14, 1 }
0x2922   :  { %v2786_v16 = vmax.f32 %v2784_v14, %v2785_v15 }
0x2924   :  { %4256 = vpush %v2786_v16 }
0x2955   :  { %s4257_s23 = spop %4256 }
0x2956   :  { %s2788_s24 = smax.f32 %s4448_s2, %s4257_s23 }
0x2957   :  { %v2789_v17 = vstv %s2788_s24 }
0x2958   :  { %4337 = vrcp.f32 %v2789_v17 }
0x2965   :  { %v4338_v18 = vpop.eup %4337 }
0x2966   :  { %v2792_v19 = vmul.f32 %v4338_v18, %v4136_v0  ;;  %v2791_v21 = vmul.f32 %v4338_v18, %v2765_v6 }
0x2968   :  { %4137 = vmatprep.subr.mxu0 %v2792_v19  ;;  %4141 = vmatprep.mubr.msk.f32.mxu0 %vm142_vm1, %v2791_v21 }
0x2969   :  { %4138 = vmatpush3.msra.mxu0 %v2792_v19 }
0x296a   :  { %4139 = vmatprep.subr.mxu0 %v2791_v21 }
0x296b   :  { %4140 = vmatpush3.msra.mxu0 %v2791_v21 }
0x296c   :  { %4142 = vmatmul.mubr.msk.f32.vlgmr.msra.gmra.mxu0 %vm142_vm1, %v2792_v19 }
0x2a2c   :  { %v4143_v23 = vpop.f32.mrf.mxu0 }
0x2a2d   :  { %v2875_v24 = vand.u32 2147483647, %v4143_v23 }
0x2a2e   :  { %v2865_v25 = vpop.f32.mrf.mxu0 }
0x2a2f   :  { %v2874_v26 = vand.u32 2147483647, %v2865_v25  ;;  %v2877_v28 = vsel %vm142_vm1, %v2875_v24, -inf }
0x2a31   :  { %v2876_v27 = vsel %vm142_vm1, %v2874_v26, -inf }
0x2a32   :  { %v2878_v29 = vmax.f32 %v2876_v27, %v2877_v28 }
0x2a34   :  { %2879 = vmax.xlane.f32.xlu1 %v2878_v29 }
0x2abd   :  { %v2880_v30 = vpop.xlane.xlu1 %2879 }
0x2abe   :  { %v2881_v2 = vrot.slane %v2880_v30, 4 }
0x2ac0   :  { %v2882_v31 = vmax.f32 %v2880_v30, %v2881_v2 }
0x2ac2   :  { %v2883_v32 = vrot.slane %v2882_v31, 2 }
0x2ac4   :  { %v2884_v33 = vmax.f32 %v2882_v31, %v2883_v32 }
0x2ac6   :  { %v2885_v34 = vrot.slane %v2884_v33, 1 }
0x2ac8   :  { %v2886_v35 = vmax.f32 %v2884_v33, %v2885_v34 }
0x2aca   :  { %4258 = vpush %v2886_v35 }
0x2afb   :  { %s4259_s25 = spop %4258 }
0x2afc   :  { %s2888_s26 = smax.f32 %s4448_s2, %s4259_s25 }
0x2afd   :  { %v2889_v36 = vstv %s2888_s26 }
0x2afe   :  { %4339 = vrcp.f32 %v2889_v36 }
0x2b0b   :  { %v4340_v22 = vpop.eup %4339 }
0x2b0c   :  { %v2892_v37 = vmul.f32 %v4340_v22, %v4143_v23  ;;  %v2891_v38 = vmul.f32 %v4340_v22, %v2865_v25 }
0x2b0e   :  { %4144 = vmatprep.subr.mxu1 %v2892_v37  ;;  %4148 = vmatprep.mubr.msk.f32.mxu1 %vm142_vm1, %v2891_v38 }
0x2b0f   :  { %4145 = vmatpush3.msra.mxu1 %v2892_v37 }
0x2b10   :  { %4146 = vmatprep.subr.mxu1 %v2891_v38 }
0x2b11   :  { %4147 = vmatpush3.msra.mxu1 %v2891_v38 }
0x2b12   :  { %4149 = vmatmul.mubr.msk.f32.vlgmr.msra.gmra.mxu1 %vm142_vm1, %v2892_v37 }
0x2bd2   :  { %v4150_v39 = vpop.f32.mrf.mxu1 }
0x2bd3   :  { %v2975_v40 = vand.u32 2147483647, %v4150_v39 }
0x2bd4   :  { %v2965_v41 = vpop.f32.mrf.mxu1 }
0x2bd5   :  { %v2974_v42 = vand.u32 2147483647, %v2965_v41  ;;  %v2977_v44 = vsel %vm142_vm1, %v2975_v40, -inf }
0x2bd7   :  { %v2976_v43 = vsel %vm142_vm1, %v2974_v42, -inf }
0x2bd8   :  { %v2978_v45 = vmax.f32 %v2976_v43, %v2977_v44 }
0x2bda   :  { %2979 = vmax.xlane.f32.xlu0 %v2978_v45 }
0x2c63   :  { %v2980_v47 = vpop.xlane.xlu0 %2979 }
0x2c64   :  { %v2981_v48 = vrot.slane %v2980_v47, 4 }
0x2c66   :  { %v2982_v49 = vmax.f32 %v2980_v47, %v2981_v48 }
0x2c68   :  { %v2983_v50 = vrot.slane %v2982_v49, 2 }
0x2c6a   :  { %v2984_v51 = vmax.f32 %v2982_v49, %v2983_v50 }
0x2c6c   :  { %v2985_v52 = vrot.slane %v2984_v51, 1 }
0x2c6e   :  { %v2986_v53 = vmax.f32 %v2984_v51, %v2985_v52 }
0x2c70   :  { %4260 = vpush %v2986_v53 }
0x2ca1   :  { %s4261_s1 = spop %4260 }
0x2ca2   :  { %s2988_s27 = smax.f32 %s4448_s2, %s4261_s1 }
0x2ca3   :  { %v2989_v58 = vstv %s2988_s27 }
0x2ca4   :  { %4341 = vrcp.f32 %v2989_v58 }
0x2cb1   :  { %v4342_v4 = vpop.eup %4341 }
0x2cb2   :  { %v2992_v54 = vmul.f32 %v4342_v4, %v4150_v39  ;;  %v2991_v55 = vmul.f32 %v4342_v4, %v2965_v41 }
0x2cb4   :  { %4151 = vmatprep.subr.mxu0 %v2992_v54  ;;  %4155 = vmatprep.mubr.msk.f32.mxu0 %vm142_vm1, %v2991_v55 }
0x2cb5   :  { %4152 = vmatpush3.msra.mxu0 %v2992_v54 }
0x2cb6   :  { %4153 = vmatprep.subr.mxu0 %v2991_v55 }
0x2cb7   :  { %4154 = vmatpush3.msra.mxu0 %v2991_v55 }
0x2cb8   :  { %4156 = vmatmul.mubr.msk.f32.vlgmr.msra.gmra.mxu0 %vm142_vm1, %v2992_v54 }
0x2d78   :  { %v4157_v56 = vpop.f32.mrf.mxu0 }
0x2d79   :  { %v3075_v57 = vand.u32 2147483647, %v4157_v56 }
0x2d7a   :  { %v3065_v59 = vpop.f32.mrf.mxu0 }
0x2d7b   :  { %v3074_v60 = vand.u32 2147483647, %v3065_v59  ;;  %v3077_v62 = vsel %vm142_vm1, %v3075_v57, -inf }
0x2d7d   :  { %v3076_v61 = vsel %vm142_vm1, %v3074_v60, -inf }
0x2d7e   :  { %v3078_v63 = vmax.f32 %v3076_v61, %v3077_v62 }
0x2d80   :  { %3079 = vmax.xlane.f32.xlu1 %v3078_v63 }
0x2e09   :  { %v3080_v0 = vpop.xlane.xlu1 %3079 }
0x2e0a   :  { %v3081_v3 = vrot.slane %v3080_v0, 4 }
0x2e0c   :  { %v3082_v6 = vmax.f32 %v3080_v0, %v3081_v3 }
0x2e0e   :  { %v3083_v7 = vrot.slane %v3082_v6, 2 }
0x2e10   :  { %v3084_v8 = vmax.f32 %v3082_v6, %v3083_v7 }
0x2e12   :  { %v3085_v9 = vrot.slane %v3084_v8, 1 }
0x2e14   :  { %v3086_v10 = vmax.f32 %v3084_v8, %v3085_v9 }
0x2e16   :  { %4262 = vpush %v3086_v10 }
0x2e47   :  { %s4263_s0 = spop %4262 }
0x2e48   :  { %s3088_s28 = smax.f32 %s4448_s2, %s4263_s0 }
0x2e49   :  { %v3089_v11 = vstv %s3088_s28 }
0x2e4a   :  { %4343 = vrcp.f32 %v3089_v11 }
0x2e57   :  { %v4344_v12 = vpop.eup %4343 }
0x2e58   :  { %v3092_v13 = vmul.f32 %v4344_v12, %v4157_v56  ;;  %v3091_v20 = vmul.f32 %v4344_v12, %v3065_v59 }
0x2e5a   :  { %4158 = vmatprep.subr.mxu1 %v3092_v13  ;;  %4162 = vmatprep.mubr.msk.f32.mxu1 %vm142_vm1, %v3091_v20 }
0x2e5b   :  { %4159 = vmatpush3.msra.mxu1 %v3092_v13 }
0x2e5c   :  { %4160 = vmatprep.subr.mxu1 %v3091_v20 }
0x2e5d   :  { %4161 = vmatpush3.msra.mxu1 %v3091_v20 }
0x2e5e   :  { %4163 = vmatmul.mubr.msk.f32.vlgmr.msra.gmra.mxu1 %vm142_vm1, %v3092_v13 }
0x2f1e   :  { %v4164_v14 = vpop.f32.mrf.mxu1 }
0x2f1f   :  { %v3175_v15 = vand.u32 2147483647, %v4164_v14 }
0x2f20   :  { %v3165_v16 = vpop.f32.mrf.mxu1 }
0x2f21   :  { %v3174_v17 = vand.u32 2147483647, %v3165_v16  ;;  %v3177_v19 = vsel %vm142_vm1, %v3175_v15, -inf }
0x2f23   :  { %v3176_v18 = vsel %vm142_vm1, %v3174_v17, -inf }
0x2f24   :  { %v3178_v21 = vmax.f32 %v3176_v18, %v3177_v19 }
0x2f26   :  { %3179 = vmax.xlane.f32.xlu0 %v3178_v21 }
0x2faf   :  { %v3180_v23 = vpop.xlane.xlu0 %3179 }
0x2fb0   :  { %v3181_v24 = vrot.slane %v3180_v23, 4 }
0x2fb2   :  { %v3182_v25 = vmax.f32 %v3180_v23, %v3181_v24 }
0x2fb4   :  { %v3183_v26 = vrot.slane %v3182_v25, 2 }
0x2fb6   :  { %v3184_v27 = vmax.f32 %v3182_v25, %v3183_v26 }
0x2fb8   :  { %v3185_v28 = vrot.slane %v3184_v27, 1 }
0x2fba   :  { %v3186_v29 = vmax.f32 %v3184_v27, %v3185_v28 }
0x2fbc   :  { %4264 = vpush %v3186_v29 }
0x2fed   :  { %s4265_s29 = spop %4264 }
0x2fee   :  { %s3188_s30 = smax.f32 %s4448_s2, %s4265_s29 }
0x2fef   :  { %v3189_v30 = vstv %s3188_s30 }
0x2ff0   :  { %4345 = vrcp.f32 %v3189_v30 }
0x2ffd   :  { %v4346_v2 = vpop.eup %4345 }
0x2ffe   :  { %v3192_v31 = vmul.f32 %v4346_v2, %v4164_v14  ;;  %v3191_v32 = vmul.f32 %v4346_v2, %v3165_v16 }
0x3000   :  { %4165 = vmatprep.subr.mxu0 %v3192_v31  ;;  %4169 = vmatprep.mubr.msk.f32.mxu0 %vm142_vm1, %v3191_v32 }
0x3001   :  { %4166 = vmatpush3.msra.mxu0 %v3192_v31 }
0x3002   :  { %4167 = vmatprep.subr.mxu0 %v3191_v32 }
0x3003   :  { %4168 = vmatpush3.msra.mxu0 %v3191_v32 }
0x3004   :  { %4170 = vmatmul.mubr.msk.f32.vlgmr.msra.gmra.mxu0 %vm142_vm1, %v3192_v31 }
0x30c4   :  { %v4171_v33 = vpop.f32.mrf.mxu0 }
0x30c5   :  { %v3275_v34 = vand.u32 2147483647, %v4171_v33 }
0x30c6   :  { %v3265_v35 = vpop.f32.mrf.mxu0 }
0x30c7   :  { %v3274_v36 = vand.u32 2147483647, %v3265_v35  ;;  %v3277_v37 = vsel %vm142_vm1, %v3275_v34, -inf }
0x30c9   :  { %v3276_v22 = vsel %vm142_vm1, %v3274_v36, -inf }
0x30ca   :  { %v3278_v38 = vmax.f32 %v3276_v22, %v3277_v37 }
0x30cc   :  { %3279 = vmax.xlane.f32.xlu1 %v3278_v38 }
0x3155   :  { %v3280_v39 = vpop.xlane.xlu1 %3279 }
0x3156   :  { %v3281_v40 = vrot.slane %v3280_v39, 4 }
0x3158   :  { %v3282_v41 = vmax.f32 %v3280_v39, %v3281_v40 }
0x315a   :  { %v3283_v42 = vrot.slane %v3282_v41, 2 }
0x315c   :  { %v3284_v43 = vmax.f32 %v3282_v41, %v3283_v42 }
0x315e   :  { %v3285_v44 = vrot.slane %v3284_v43, 1 }
0x3160   :  { %v3286_v45 = vmax.f32 %v3284_v43, %v3285_v44 }
0x3162   :  { %4266 = vpush %v3286_v45 }
0x3193   :  { %s4267_s4 = spop %4266 }
0x3194   :  { %s3288_s5 = smax.f32 %s4448_s2, %s4267_s4 }
0x3195   :  { %v3289_v47 = vstv %s3288_s5 }
0x3196   :  { %4347 = vrcp.f32 %v3289_v47 }
0x31a3   :  { %v4348_v48 = vpop.eup %4347 }
0x31a4   :  { %v3292_v49 = vmul.f32 %v4348_v48, %v4171_v33  ;;  %v3291_v50 = vmul.f32 %v4348_v48, %v3265_v35 }
0x31a6   :  { %4172 = vmatprep.subr.mxu1 %v3292_v49  ;;  %4176 = vmatprep.mubr.msk.f32.mxu1 %vm142_vm1, %v3291_v50 }
0x31a7   :  { %4173 = vmatpush3.msra.mxu1 %v3292_v49 }
0x31a8   :  { %4174 = vmatprep.subr.mxu1 %v3291_v50 }
0x31a9   :  { %4175 = vmatpush3.msra.mxu1 %v3291_v50 }
0x31aa   :  { %4177 = vmatmul.mubr.msk.f32.vlgmr.msra.gmra.mxu1 %vm142_vm1, %v3292_v49 }
0x326a   :  { %v4178_v51 = vpop.f32.mrf.mxu1 }
0x326b   :  { %v3375_v52 = vand.u32 2147483647, %v4178_v51 }
0x326c   :  { %v3365_v53 = vpop.f32.mrf.mxu1 }
0x326d   :  { %v3374_v58 = vand.u32 2147483647, %v3365_v53  ;;  %v3377_v54 = vsel %vm142_vm1, %v3375_v52, -inf }
0x326f   :  { %v3376_v4 = vsel %vm142_vm1, %v3374_v58, -inf }
0x3270   :  { %v3378_v55 = vmax.f32 %v3376_v4, %v3377_v54 }
0x3272   :  { %3379 = vmax.xlane.f32.xlu0 %v3378_v55 }
0x32fb   :  { %v3380_v56 = vpop.xlane.xlu0 %3379 }
0x32fc   :  { %v3381_v57 = vrot.slane %v3380_v56, 4 }
0x32fe   :  { %v3382_v59 = vmax.f32 %v3380_v56, %v3381_v57 }
0x3300   :  { %v3383_v60 = vrot.slane %v3382_v59, 2 }
0x3302   :  { %v3384_v61 = vmax.f32 %v3382_v59, %v3383_v60 }
0x3304   :  { %v3385_v62 = vrot.slane %v3384_v61, 1 }
0x3306   :  { %v3386_v63 = vmax.f32 %v3384_v61, %v3385_v62 }
0x3308   :  { %4268 = vpush %v3386_v63 }
0x3339   :  { %s4269_s6 = spop %4268 }
0x333a   :  { %s3388_s7 = smax.f32 %s4448_s2, %s4269_s6 }
0x333b   :  { %v3389_v0 = vstv %s3388_s7 }
0x333c   :  { %4349 = vrcp.f32 %v3389_v0 }
0x3349   :  { %v4350_v3 = vpop.eup %4349 }
0x334a   :  { %v3392_v6 = vmul.f32 %v4350_v3, %v4178_v51  ;;  %v3391_v7 = vmul.f32 %v4350_v3, %v3365_v53 }
0x334c   :  { %4179 = vmatprep.subr.mxu0 %v3392_v6  ;;  %4183 = vmatprep.mubr.msk.f32.mxu0 %vm142_vm1, %v3391_v7 }
0x334d   :  { %4180 = vmatpush3.msra.mxu0 %v3392_v6 }
0x334e   :  { %4181 = vmatprep.subr.mxu0 %v3391_v7 }
0x334f   :  { %4182 = vmatpush3.msra.mxu0 %v3391_v7 }
0x3350   :  { %4184 = vmatmul.mubr.msk.f32.vlgmr.msra.gmra.mxu0 %vm142_vm1, %v3392_v6 }
0x3351   :  { %4197 = vmatprep.mubr.msk.f32.mxu0 %vm142_vm1, %v4637_v5 }
0x3410   :  { %v4185_v8 = vpop.f32.mrf.mxu0 }
0x3411   :  { %v3475_v9 = vand.u32 2147483647, %v4185_v8 }
0x3412   :  { %v3465_v10 = vpop.f32.mrf.mxu0 }
0x3413   :  { %v3474_v11 = vand.u32 2147483647, %v3465_v10  ;;  %v3477_v13 = vsel %vm142_vm1, %v3475_v9, -inf }
0x3415   :  { %v3476_v12 = vsel %vm142_vm1, %v3474_v11, -inf }
0x3416   :  { %v3478_v20 = vmax.f32 %v3476_v12, %v3477_v13 }
0x3418   :  { %3479 = vmax.xlane.f32.xlu1 %v3478_v20 }
0x34a1   :  { %v3480_v14 = vpop.xlane.xlu1 %3479 }
0x34a2   :  { %v3481_v15 = vrot.slane %v3480_v14, 4 }
0x34a4   :  { %v3482_v16 = vmax.f32 %v3480_v14, %v3481_v15 }
0x34a6   :  { %v3483_v17 = vrot.slane %v3482_v16, 2 }
0x34a8   :  { %v3484_v18 = vmax.f32 %v3482_v16, %v3483_v17 }
0x34aa   :  { %v3485_v19 = vrot.slane %v3484_v18, 1 }
0x34ac   :  { %v3486_v21 = vmax.f32 %v3484_v18, %v3485_v19 }
0x34ae   :  { %4270 = vpush %v3486_v21 }
0x34df   :  { %s4271_s8 = spop %4270 }
0x34e0   :  { %s3488_s9 = smax.f32 %s4448_s2, %s4271_s8 }
0x34e1   :  { %v3489_v5 = vstv %s3488_s9 }
0x34e2   :  { %4351 = vrcp.f32 %v3489_v5 }
0x34ef   :  { %v4352_v23 = vpop.eup %4351 }
0x34f0   :  { %v3492_v24 = vmul.f32 %v4352_v23, %v4185_v8  ;;  %v3491_v25 = vmul.f32 %v4352_v23, %v3465_v10 }
0x34f2   :  { %4186 = vmatprep.subr.mxu1 %v3492_v24  ;;  %4190 = vmatprep.mubr.msk.f32.mxu1 %vm142_vm1, %v3491_v25 }
0x34f3   :  { %4187 = vmatpush3.msra.mxu1 %v3492_v24 }
0x34f4   :  { %4188 = vmatprep.subr.mxu1 %v3491_v25 }
0x34f5   :  { %4189 = vmatpush3.msra.mxu1 %v3491_v25 }
0x34f6   :  { %4191 = vmatmul.mubr.msk.f32.vlgmr.msra.gmra.mxu1 %vm142_vm1, %v3492_v24 }
0x35b6   :  { %v4192_v26 = vpop.f32.mrf.mxu1 }
0x35b7   :  { %v3575_v27 = vand.u32 2147483647, %v4192_v26 }
0x35b8   :  { %v3565_v28 = vpop.f32.mrf.mxu1 }
0x35b9   :  { %v3574_v29 = vand.u32 2147483647, %v3565_v28  ;;  %v3577_v2 = vsel %vm142_vm1, %v3575_v27, -inf }
0x35bb   :  { %v3576_v30 = vsel %vm142_vm1, %v3574_v29, -inf }
0x35bc   :  { %v3578_v31 = vmax.f32 %v3576_v30, %v3577_v2 }
0x35be   :  { %3579 = vmax.xlane.f32.xlu0 %v3578_v31 }
0x3647   :  { %v3580_v32 = vpop.xlane.xlu0 %3579 }
0x3648   :  { %v3581_v33 = vrot.slane %v3580_v32, 4 }
0x364a   :  { %v3582_v34 = vmax.f32 %v3580_v32, %v3581_v33 }
0x364c   :  { %v3583_v35 = vrot.slane %v3582_v34, 2 }
0x364e   :  { %v3584_v36 = vmax.f32 %v3582_v34, %v3583_v35 }
0x3650   :  { %v3585_v22 = vrot.slane %v3584_v36, 1 }
0x3652   :  { %v3586_v37 = vmax.f32 %v3584_v36, %v3585_v22 }
0x3654   :  { %4272 = vpush %v3586_v37 }
0x3685   :  { %s4273_s10 = spop %4272 }
0x3686   :  { %s3588_s11 = smax.f32 %s4448_s2, %s4273_s10 }
0x3687   :  { %v3589_v38 = vstv %s3588_s11 }
0x3688   :  { %4353 = vrcp.f32 %v3589_v38 }
0x3695   :  { %v4354_v39 = vpop.eup %4353 }
0x3696   :  { %v3592_v40 = vmul.f32 %v4354_v39, %v4192_v26  ;;  %v3591_v41 = vmul.f32 %v4354_v39, %v3565_v28 }
0x3698   :  { %4193 = vmatprep.subr.mxu0 %v3592_v40  ;;  %v3689_v42 = vmul.f32 %v3591_v41, %v3591_v41  ;;  %v3690_v43 = vmul.f32 %v3592_v40, %v3592_v40 }
0x3699   :  { %4194 = vmatpush3.msra.mxu0 %v3592_v40 }
0x369a   :  { %4195 = vmatprep.subr.mxu0 %v3591_v41  ;;  %v3691_v44 = vsel %vm142_vm1, %v3689_v42, 0.0  ;;  %v3692_v45 = vsel %vm142_vm1, %v3690_v43, 0.0 }
0x369b   :  { %4196 = vmatpush3.msra.mxu0 %v3591_v41  ;;  %v3693_v47 = vadd.f32 %v3692_v45, %v3691_v44 }
0x369c   :  { %4198 = vmatmul.mubr.msk.f32.vlgmr.msra.gmra.mxu0 %vm142_vm1, %v4635_v1 }
0x369d   :  { %3694 = vadd.xlane.f32.xlu0 %v3693_v47 }
0x3726   :  { %v3695_v4 = vpop.xlane.xlu0 %3694 }
0x3727   :  { %v3696_v54 = vrot.slane %v3695_v4, 4 }
0x3729   :  { %v3697_v55 = vadd.f32 %v3696_v54, %v3695_v4 }
0x372b   :  { %v3698_v56 = vrot.slane %v3697_v55, 2 }
0x372d   :  { %v3699_v61 = vadd.f32 %v3698_v56, %v3697_v55 }
0x372f   :  { %v3700_v63 = vrot.slane %v3699_v61, 1 }
0x3731   :  { %v3701_v6 = vadd.f32 %v3700_v63, %v3699_v61 }
0x375c   :  { %v4199_v48 = vpop.f32.mrf.mxu0 }
0x375d   :  { %v3675_v49 = vmul.f32 %v4199_v48, %v3592_v40 }
0x375e   :  { %v3665_v50 = vpop.f32.mrf.mxu0 }
0x375f   :  { %v3674_v51 = vmul.f32 %v3665_v50, %v3591_v41  ;;  %v3677_v53 = vsel %vm142_vm1, %v3675_v49, 0.0 }
0x3761   :  { %v3676_v52 = vsel %vm142_vm1, %v3674_v51, 0.0 }
0x3762   :  { %v3678_v58 = vadd.f32 %v3677_v53, %v3676_v52 }
0x3764   :  { %3679 = vadd.xlane.f32.xlu1 %v3678_v58 }
0x37ed   :  { %v3680_v57 = vpop.xlane.xlu1 %3679 }
0x37ee   :  { %v3681_v59 = vrot.slane %v3680_v57, 4 }
0x37f0   :  { %v3682_v60 = vadd.f32 %v3681_v59, %v3680_v57 }
0x37f2   :  { %v3683_v1 = vrot.slane %v3682_v60, 2 }
0x37f4   :  { %v3684_v62 = vadd.f32 %v3683_v1, %v3682_v60 }
0x37f6   :  { %v3685_v0 = vrot.slane %v3684_v62, 1 }
0x37f8   :  { %v3686_v3 = vadd.f32 %v3685_v0, %v3684_v62 }
0x37fa   :  { %4274 = vpush %v3686_v3 }
0x37fb   :  { %4276 = vpush %v3701_v6 }
0x382b   :  { %s4275_s2 = spop %4274 }
0x382c   :  { %s4277_s12 = spop %4276  ;;  %v3688_v10 = vstv %s4275_s2 }
0x382d   :  { %v3703_v7 = vstv %s4277_s12 }
0x382e   :  { %v3704_v8 = vadd.f32 1e-30, %v3703_v7 }
0x3830   :  { %4355 = vrcp.f32 %v3704_v8 }
0x383d   :  { %v4356_v9 = vpop.eup %4355 }
0x383e   :  { %v3706_v11 = vmul.f32 %v4356_v9, %v3688_v10 }
0x3840   :  { %v3707_v12 = vadd.f32 %v3706_v11, %v4649_v46 }
0x3842   :  { %3709 = vst.msk [vmem:[#allocation8] sm:$0x1] %vm3708_vm2, %v3707_v12 }
0x3843   :  { %4428 = shalt.err (!%p4425_p5)
}
0x3844   :  { %3719 = dma.vmem_to_hbm [thread:$0]  %s3717_s14, 16, %s4716_s3, [#allocation4]  }
0x3845   :  { %4441 = dma.done.wait [#allocation4], 16  }
0x3846   :  { %4442 = vsyncadd [#allocation4], 4294967280 }
0x3847   :  { %3723 = vsyncpa [#allocation3], 1 }
0x3848   :  { %3724 = vsyncpa [#allocation6], 1 }
0x3849   :  { %3725 = vsyncpa [#allocation4], 1 }

</bundles_post_ra>
